<compile_context>
chip_gen: v7x
topology: tpu7x:2x2x1
jax: 0.10.0
libtpu: 0.0.40
codegen_flags: <defaults>
</compile_context>

<pallas_src>
import functools

import jax
import jax.numpy as jnp
from jax import lax
from jax.experimental import pallas as pl
from jax.experimental.pallas import tpu as pltpu

BN_EPS = 1e-5


def _round_up(x, m):
    return (x + m - 1) // m * m


# ----------------------------------------------------------------------------
# Pallas kernels
# ----------------------------------------------------------------------------
def _conv3x3_kernel(x_ref, w_ref, mask_ref, y_ref, s_ref, ss_ref, *, Wp, R_out):
    """3x3 conv on the flattened padded spatial grid + fused BN partial sums.

    x_ref   : (1, Cin, R_in)   bf16  flattened zero-padded input (spatial on lanes)
    w_ref   : (9, Cout, Cin)   bf16  one (Cout, Cin) matrix per filter tap
    mask_ref: (1, R_out)       f32   1.0 on valid output lanes, 0.0 on junk lanes
    y_ref   : (1, Cout, R_out) bf16  conv output (pre-BN), stored half-width
    s_ref   : (1, Cout, 1)     f32   per-sample per-channel sum (valid lanes only)
    ss_ref  : (1, Cout, 1)     f32   per-sample per-channel sum of squares
    """
    xt = x_ref[0]                                    # (Cin, R_in) bf16, resident
    cout = y_ref.shape[1]
    acc = jnp.zeros((cout, R_out), jnp.float32)
    for t in range(9):                               # unrolled: 9 bf16 MXU matmuls
        dy, dx = divmod(t, 3)
        off = dy * Wp + dx
        win = xt[:, off:off + R_out]                 # static lane-shifted window
        acc = acc + jnp.dot(w_ref[t], win, preferred_element_type=jnp.float32)
    y_ref[0] = acc.astype(y_ref.dtype)               # bf16 store -> half HBM bytes
    am = acc * mask_ref[...]                         # zero out junk spatial lanes
    s_ref[0] = jnp.sum(am, axis=1, keepdims=True)
    ss_ref[0] = jnp.sum(am * acc, axis=1, keepdims=True)


def _bn_relu_pool_kernel(y_ref, sc_ref, sh_ref, mask_ref, ps_ref):
    """Per-sample, per-channel sum over valid lanes of ReLU(scale*y + shift)."""
    a = jnp.maximum(y_ref[0].astype(jnp.float32) * sc_ref[...] + sh_ref[...], 0.0)
    ps_ref[0] = jnp.sum(a * mask_ref[...], axis=1, keepdims=True)


def _bn_relu_att_kernel(y_ref, sc_ref, sh_ref, att_ref, o_ref):
    """Recompute BN+ReLU from the bf16 conv map and apply per-sample attention."""
    a = jnp.maximum(y_ref[0].astype(jnp.float32) * sc_ref[...] + sh_ref[...], 0.0)
    o_ref[0] = a * att_ref[0]


# ----------------------------------------------------------------------------
# Forward pass
# ----------------------------------------------------------------------------
def arm_forward(x, params):
    """AttentionRefinmentModule forward.  x: (N, Cin, H, W) f32 -> (N, Cout, H, W) f32."""
    Nb, Cin, H, W = x.shape
    w3 = params["w3"]                                # (9, Cout, Cin) bf16
    Cout = w3.shape[1]
    Hp, Wp = H + 2, W + 2
    R_out = _round_up(Hp * Wp, 128)                  # output lanes on padded grid
    R_in = _round_up(R_out + 2 * Wp + 2, 128)        # room for the largest tap shift

    # ---- input prep: bf16 cast first, then spatial pad + flatten (one fused pass,
    #      no transpose, no channel padding) ----
    xb = x.astype(jnp.bfloat16)
    xp = jnp.pad(xb, ((0, 0), (0, 0), (1, 1), (1, 1)))
    x_flat = jnp.pad(xp.reshape(Nb, Cin, Hp * Wp),
                     ((0, 0), (0, 0), (0, R_in - Hp * Wp)))

    # validity mask over flattened padded-grid lanes (r = y*Wp + x, y<H, x<W)
    r = jnp.arange(R_out)
    mask = (((r // Wp) < H) & ((r % Wp) < W)).astype(jnp.float32).reshape(1, R_out)

    # ---- Kernel A: 3x3 conv + fused BN partial sums ----
    yconv, psum, pssq = pl.pallas_call(
        functools.partial(_conv3x3_kernel, Wp=Wp, R_out=R_out),
        out_shape=(
            jax.ShapeDtypeStruct((Nb, Cout, R_out), jnp.bfloat16),
            jax.ShapeDtypeStruct((Nb, Cout, 1), jnp.float32),
            jax.ShapeDtypeStruct((Nb, Cout, 1), jnp.float32),
        ),
        grid_spec=pltpu.PrefetchScalarGridSpec(
            num_scalar_prefetch=0,
            grid=(Nb,),
            in_specs=[
                pl.BlockSpec((1, Cin, R_in), lambda n: (n, 0, 0)),
                pl.BlockSpec((9, Cout, Cin), lambda n: (0, 0, 0)),
                pl.BlockSpec((1, R_out), lambda n: (0, 0)),
            ],
            out_specs=[
                pl.BlockSpec((1, Cout, R_out), lambda n: (n, 0, 0)),
                pl.BlockSpec((1, Cout, 1), lambda n: (n, 0, 0)),
                pl.BlockSpec((1, Cout, 1), lambda n: (n, 0, 0)),
            ],
        ),
        compiler_params=pltpu.CompilerParams(dimension_semantics=("parallel",)),
    )(x_flat, w3, mask)

    # ---- training-mode BN statistics for the 3x3 conv (tiny per-channel math) ----
    M = float(Nb * H * W)
    mean3 = jnp.sum(psum[:, :, 0], axis=0) / M
    var3 = jnp.maximum(jnp.sum(pssq[:, :, 0], axis=0) / M - mean3 * mean3, 0.0)
    g3 = params["gamma3"] * lax.rsqrt(var3 + BN_EPS)
    scale3 = g3.reshape(Cout, 1)
    shift3 = (params["beta3"] - mean3 * g3).reshape(Cout, 1)

    # ---- Kernel B: global average pool of ReLU(BN(conv)) ----
    pool_sum = pl.pallas_call(
        _bn_relu_pool_kernel,
        out_shape=jax.ShapeDtypeStruct((Nb, Cout, 1), jnp.float32),
        grid_spec=pltpu.PrefetchScalarGridSpec(
            num_scalar_prefetch=0,
            grid=(Nb,),
            in_specs=[
                pl.BlockSpec((1, Cout, R_out), lambda n: (n, 0, 0)),
                pl.BlockSpec((Cout, 1), lambda n: (0, 0)),
                pl.BlockSpec((Cout, 1), lambda n: (0, 0)),
                pl.BlockSpec((1, R_out), lambda n: (0, 0)),
            ],
            out_specs=pl.BlockSpec((1, Cout, 1), lambda n: (n, 0, 0)),
        ),
        compiler_params=pltpu.CompilerParams(dimension_semantics=("parallel",)),
    )(yconv, scale3, shift3, mask)
    pooled = pool_sum[:, :, 0] / float(H * W)                    # (Nb, Cout) f32

    # ---- attention branch in plain f32 jnp (replaces the old Kernel D) ----
    z = pooled @ params["w1"]                                    # 1x1 conv, (Nb, Cout)
    zm = jnp.mean(z, axis=0)
    zv = jnp.mean((z - zm) ** 2, axis=0)                         # two-pass variance
    g1 = params["gamma1"] * lax.rsqrt(zv + BN_EPS)
    a1 = jnp.maximum(z * g1 + (params["beta1"] - zm * g1), 0.0)
    att = jax.nn.sigmoid(a1).reshape(Nb, Cout, 1)

    # ---- Kernel C: BN+ReLU recomputed and scaled by the attention vector ----
    out_flat = pl.pallas_call(
        _bn_relu_att_kernel,
        out_shape=jax.ShapeDtypeStruct((Nb, Cout, R_out), jnp.float32),
        grid_spec=pltpu.PrefetchScalarGridSpec(
            num_scalar_prefetch=0,
            grid=(Nb,),
            in_specs=[
                pl.BlockSpec((1, Cout, R_out), lambda n: (n, 0, 0)),
                pl.BlockSpec((Cout, 1), lambda n: (0, 0)),
                pl.BlockSpec((Cout, 1), lambda n: (0, 0)),
                pl.BlockSpec((1, Cout, 1), lambda n: (n, 0, 0)),
            ],
            out_specs=pl.BlockSpec((1, Cout, R_out), lambda n: (n, 0, 0)),
        ),
        compiler_params=pltpu.CompilerParams(dimension_semantics=("parallel",)),
    )(yconv, scale3, shift3, att)

    # ---- epilogue: drop padded-grid junk lanes.  NCHW preserved end-to-end, so
    #      this is a single slice (no transpose, no padded channels). ----
    out = out_flat[:, :, :H * Wp].reshape(Nb, Cout, H, Wp)[:, :, :, :W]
    return out


# ----------------------------------------------------------------------------
# Deterministic parameter construction (matches _ConvBNReLU init semantics)
# ----------------------------------------------------------------------------
def make_arm_params(key, cin, cout):
    """kaiming_normal(fan_out) conv weights, BN gamma=1 / beta=0.
    NOTE: nn.Conv2d biases exist in the PyTorch module but are exactly cancelled by
    the training-mode BatchNorm that follows each conv, so they are dropped."""
    k3, k1 = jax.random.split(key)

    std3 = (2.0 / (cout * 9)) ** 0.5
    w3 = std3 * jax.random.normal(k3, (cout, cin, 3, 3), jnp.float32)
    # taps laid out as (dy*3+dx, Cout, Cin): each tap is a matmul LHS, bf16, dense
    w3_taps = jnp.transpose(w3, (2, 3, 0, 1)).reshape(9, cout, cin)

    std1 = (2.0 / cout) ** 0.5
    w1 = std1 * jax.random.normal(k1, (cout, cout, 1, 1), jnp.float32)
    w1_mat = jnp.transpose(w1.reshape(cout, cout))   # (Cin=cout, Cout) for right-mult

    return {
        "w3": w3_taps.astype(jnp.bfloat16),
        "gamma3": jnp.ones((cout,), jnp.float32),
        "beta3": jnp.zeros((cout,), jnp.float32),
        "w1": w1_mat,                                # f32: attention stays full precision
        "gamma1": jnp.ones((cout,), jnp.float32),
        "beta1": jnp.zeros((cout,), jnp.float32),
    }


# ----------------------------------------------------------------------------
if __name__ == "__main__":
    key = jax.random.PRNGKey(0)
    kx, kp = jax.random.split(key)

    N, Cin, H, W = 2, 32, 16, 16
    Cout = 64
    x = jax.random.normal(kx, (N, Cin, H, W), jnp.float32)
    params = make_arm_params(kp, Cin, Cout)

    fwd = jax.jit(arm_forward)
    out = jax.block_until_ready(fwd(x, params))

    assert out.shape == (N, Cout, H, W), out.shape
    assert bool(jnp.all(jnp.isfinite(out)))
    print("KERNEL_OK")
</pallas_src>

<mosaic_0001>
module attributes {stable_mosaic.version = 11 : i64} {
  func.func @_conv3x3_kernel(%arg0: i32, %arg1: memref<1x32x512xbf16, #tpu.memory_space<vmem>>, %arg2: memref<9x64x32xbf16, #tpu.memory_space<vmem>>, %arg3: memref<1x384xf32, #tpu.memory_space<vmem>>, %arg4: memref<1x64x384xbf16, #tpu.memory_space<vmem>>, %arg5: memref<1x64x1xf32, #tpu.memory_space<vmem>>, %arg6: memref<1x64x1xf32, #tpu.memory_space<vmem>>) attributes {dimension_semantics = [#tpu.dimension_semantics<parallel>], iteration_bounds = array<i64: 2>, scalar_prefetch = 0 : i64, scratch_operands = 0 : i64, tpu.core_type = #tpu.core_type<tc>, window_params = [{transform_indices = @transform_0, window_bounds = array<i64: 1, 32, 512>}, {pipeline_mode = #tpu.pipeline_mode<synchronous>, transform_indices = @transform_1, window_bounds = array<i64: 9, 64, 32>}, {pipeline_mode = #tpu.pipeline_mode<synchronous>, transform_indices = @transform_2, window_bounds = array<i64: 1, 384>}, {transform_indices = @transform_3, window_bounds = array<i64: 1, 64, 384>}, {transform_indices = @transform_4, window_bounds = array<i64: 1, 64, 1>}, {transform_indices = @transform_5, window_bounds = array<i64: 1, 64, 1>}]} {
    %c0 = arith.constant 0 : index
    %c0_0 = arith.constant 0 : index
    %c0_1 = arith.constant 0 : index
    %0 = vector.load %arg1[%c0, %c0_0, %c0_1] : memref<1x32x512xbf16, #tpu.memory_space<vmem>>, vector<1x32x512xbf16>
    %1 = vector.shape_cast %0 : vector<1x32x512xbf16> to vector<32x512xbf16>
    %cst = arith.constant 0.000000e+00 : f32
    %2 = vector.broadcast %cst : f32 to vector<64x384xf32>
    %3 = vector.extract_strided_slice %1 {offsets = [0, 0], sizes = [32, 384], strides = [1, 1]} : vector<32x512xbf16> to vector<32x384xbf16>
    %c0_2 = arith.constant 0 : index
    %c0_3 = arith.constant 0 : index
    %c0_4 = arith.constant 0 : index
    %4 = vector.load %arg2[%c0_2, %c0_3, %c0_4] : memref<9x64x32xbf16, #tpu.memory_space<vmem>>, vector<1x64x32xbf16>
    %5 = vector.shape_cast %4 : vector<1x64x32xbf16> to vector<64x32xbf16>
    %cst_5 = arith.constant dense<0.000000e+00> : vector<64x384xf32>
    %6 = tpu.matmul %5, %3, %cst_5 {dimension_numbers = #tpu.dot_dimension_numbers<[1], [0], [0], [1], [0, 0, 1, 1], [], []>} : vector<64x32xbf16>, vector<32x384xbf16>, vector<64x384xf32> -> vector<64x384xf32>
    %7 = arith.addf %2, %6 : vector<64x384xf32>
    %8 = vector.extract_strided_slice %1 {offsets = [0, 1], sizes = [32, 384], strides = [1, 1]} : vector<32x512xbf16> to vector<32x384xbf16>
    %c1 = arith.constant 1 : index
    %c0_6 = arith.constant 0 : index
    %c0_7 = arith.constant 0 : index
    %9 = vector.load %arg2[%c1, %c0_6, %c0_7] : memref<9x64x32xbf16, #tpu.memory_space<vmem>>, vector<1x64x32xbf16>
    %10 = vector.shape_cast %9 : vector<1x64x32xbf16> to vector<64x32xbf16>
    %cst_8 = arith.constant dense<0.000000e+00> : vector<64x384xf32>
    %11 = tpu.matmul %10, %8, %cst_8 {dimension_numbers = #tpu.dot_dimension_numbers<[1], [0], [0], [1], [0, 0, 1, 1], [], []>} : vector<64x32xbf16>, vector<32x384xbf16>, vector<64x384xf32> -> vector<64x384xf32>
    %12 = arith.addf %7, %11 : vector<64x384xf32>
    %13 = vector.extract_strided_slice %1 {offsets = [0, 2], sizes = [32, 384], strides = [1, 1]} : vector<32x512xbf16> to vector<32x384xbf16>
    %c2 = arith.constant 2 : index
    %c0_9 = arith.constant 0 : index
    %c0_10 = arith.constant 0 : index
    %14 = vector.load %arg2[%c2, %c0_9, %c0_10] : memref<9x64x32xbf16, #tpu.memory_space<vmem>>, vector<1x64x32xbf16>
    %15 = vector.shape_cast %14 : vector<1x64x32xbf16> to vector<64x32xbf16>
    %cst_11 = arith.constant dense<0.000000e+00> : vector<64x384xf32>
    %16 = tpu.matmul %15, %13, %cst_11 {dimension_numbers = #tpu.dot_dimension_numbers<[1], [0], [0], [1], [0, 0, 1, 1], [], []>} : vector<64x32xbf16>, vector<32x384xbf16>, vector<64x384xf32> -> vector<64x384xf32>
    %17 = arith.addf %12, %16 : vector<64x384xf32>
    %18 = vector.extract_strided_slice %1 {offsets = [0, 18], sizes = [32, 384], strides = [1, 1]} : vector<32x512xbf16> to vector<32x384xbf16>
    %c3 = arith.constant 3 : index
    %c0_12 = arith.constant 0 : index
    %c0_13 = arith.constant 0 : index
    %19 = vector.load %arg2[%c3, %c0_12, %c0_13] : memref<9x64x32xbf16, #tpu.memory_space<vmem>>, vector<1x64x32xbf16>
    %20 = vector.shape_cast %19 : vector<1x64x32xbf16> to vector<64x32xbf16>
    %cst_14 = arith.constant dense<0.000000e+00> : vector<64x384xf32>
    %21 = tpu.matmul %20, %18, %cst_14 {dimension_numbers = #tpu.dot_dimension_numbers<[1], [0], [0], [1], [0, 0, 1, 1], [], []>} : vector<64x32xbf16>, vector<32x384xbf16>, vector<64x384xf32> -> vector<64x384xf32>
    %22 = arith.addf %17, %21 : vector<64x384xf32>
    %23 = vector.extract_strided_slice %1 {offsets = [0, 19], sizes = [32, 384], strides = [1, 1]} : vector<32x512xbf16> to vector<32x384xbf16>
    %c4 = arith.constant 4 : index
    %c0_15 = arith.constant 0 : index
    %c0_16 = arith.constant 0 : index
    %24 = vector.load %arg2[%c4, %c0_15, %c0_16] : memref<9x64x32xbf16, #tpu.memory_space<vmem>>, vector<1x64x32xbf16>
    %25 = vector.shape_cast %24 : vector<1x64x32xbf16> to vector<64x32xbf16>
    %cst_17 = arith.constant dense<0.000000e+00> : vector<64x384xf32>
    %26 = tpu.matmul %25, %23, %cst_17 {dimension_numbers = #tpu.dot_dimension_numbers<[1], [0], [0], [1], [0, 0, 1, 1], [], []>} : vector<64x32xbf16>, vector<32x384xbf16>, vector<64x384xf32> -> vector<64x384xf32>
    %27 = arith.addf %22, %26 : vector<64x384xf32>
    %28 = vector.extract_strided_slice %1 {offsets = [0, 20], sizes = [32, 384], strides = [1, 1]} : vector<32x512xbf16> to vector<32x384xbf16>
    %c5 = arith.constant 5 : index
    %c0_18 = arith.constant 0 : index
    %c0_19 = arith.constant 0 : index
    %29 = vector.load %arg2[%c5, %c0_18, %c0_19] : memref<9x64x32xbf16, #tpu.memory_space<vmem>>, vector<1x64x32xbf16>
    %30 = vector.shape_cast %29 : vector<1x64x32xbf16> to vector<64x32xbf16>
    %cst_20 = arith.constant dense<0.000000e+00> : vector<64x384xf32>
    %31 = tpu.matmul %30, %28, %cst_20 {dimension_numbers = #tpu.dot_dimension_numbers<[1], [0], [0], [1], [0, 0, 1, 1], [], []>} : vector<64x32xbf16>, vector<32x384xbf16>, vector<64x384xf32> -> vector<64x384xf32>
    %32 = arith.addf %27, %31 : vector<64x384xf32>
    %33 = vector.extract_strided_slice %1 {offsets = [0, 36], sizes = [32, 384], strides = [1, 1]} : vector<32x512xbf16> to vector<32x384xbf16>
    %c6 = arith.constant 6 : index
    %c0_21 = arith.constant 0 : index
    %c0_22 = arith.constant 0 : index
    %34 = vector.load %arg2[%c6, %c0_21, %c0_22] : memref<9x64x32xbf16, #tpu.memory_space<vmem>>, vector<1x64x32xbf16>
    %35 = vector.shape_cast %34 : vector<1x64x32xbf16> to vector<64x32xbf16>
    %cst_23 = arith.constant dense<0.000000e+00> : vector<64x384xf32>
    %36 = tpu.matmul %35, %33, %cst_23 {dimension_numbers = #tpu.dot_dimension_numbers<[1], [0], [0], [1], [0, 0, 1, 1], [], []>} : vector<64x32xbf16>, vector<32x384xbf16>, vector<64x384xf32> -> vector<64x384xf32>
    %37 = arith.addf %32, %36 : vector<64x384xf32>
    %38 = vector.extract_strided_slice %1 {offsets = [0, 37], sizes = [32, 384], strides = [1, 1]} : vector<32x512xbf16> to vector<32x384xbf16>
    %c7 = arith.constant 7 : index
    %c0_24 = arith.constant 0 : index
    %c0_25 = arith.constant 0 : index
    %39 = vector.load %arg2[%c7, %c0_24, %c0_25] : memref<9x64x32xbf16, #tpu.memory_space<vmem>>, vector<1x64x32xbf16>
    %40 = vector.shape_cast %39 : vector<1x64x32xbf16> to vector<64x32xbf16>
    %cst_26 = arith.constant dense<0.000000e+00> : vector<64x384xf32>
    %41 = tpu.matmul %40, %38, %cst_26 {dimension_numbers = #tpu.dot_dimension_numbers<[1], [0], [0], [1], [0, 0, 1, 1], [], []>} : vector<64x32xbf16>, vector<32x384xbf16>, vector<64x384xf32> -> vector<64x384xf32>
    %42 = arith.addf %37, %41 : vector<64x384xf32>
    %43 = vector.extract_strided_slice %1 {offsets = [0, 38], sizes = [32, 384], strides = [1, 1]} : vector<32x512xbf16> to vector<32x384xbf16>
    %c8 = arith.constant 8 : index
    %c0_27 = arith.constant 0 : index
    %c0_28 = arith.constant 0 : index
    %44 = vector.load %arg2[%c8, %c0_27, %c0_28] : memref<9x64x32xbf16, #tpu.memory_space<vmem>>, vector<1x64x32xbf16>
    %45 = vector.shape_cast %44 : vector<1x64x32xbf16> to vector<64x32xbf16>
    %cst_29 = arith.constant dense<0.000000e+00> : vector<64x384xf32>
    %46 = tpu.matmul %45, %43, %cst_29 {dimension_numbers = #tpu.dot_dimension_numbers<[1], [0], [0], [1], [0, 0, 1, 1], [], []>} : vector<64x32xbf16>, vector<32x384xbf16>, vector<64x384xf32> -> vector<64x384xf32>
    %47 = arith.addf %42, %46 : vector<64x384xf32>
    %48 = arith.truncf %47 : vector<64x384xf32> to vector<64x384xbf16>
    %c0_30 = arith.constant 0 : index
    %c0_31 = arith.constant 0 : index
    %c0_32 = arith.constant 0 : index
    %49 = vector.load %arg4[%c0_30, %c0_31, %c0_32] : memref<1x64x384xbf16, #tpu.memory_space<vmem>>, vector<1x64x384xbf16>
    %50 = vector.shape_cast %49 : vector<1x64x384xbf16> to vector<64x384xbf16>
    %51 = vector.shape_cast %48 : vector<64x384xbf16> to vector<1x64x384xbf16>
    tpu.vector_store %arg4[%c0_30, %c0_31, %c0_32], %51 {strides = array<i32>} : memref<1x64x384xbf16, #tpu.memory_space<vmem>>, vector<1x64x384xbf16>,
    %c0_33 = arith.constant 0 : index
    %c0_34 = arith.constant 0 : index
    %52 = vector.load %arg3[%c0_33, %c0_34] : memref<1x384xf32, #tpu.memory_space<vmem>>, vector<1x384xf32>
    %53 = vector.broadcast %52 : vector<1x384xf32> to vector<64x384xf32>
    %54 = arith.mulf %47, %53 : vector<64x384xf32>
    %cst_35 = arith.constant dense<0.000000e+00> : vector<64xf32>
    %55 = vector.multi_reduction <add>, %54, %cst_35 [1] : vector<64x384xf32> to vector<64xf32>
    %56 = vector.shape_cast %55 : vector<64xf32> to vector<64x1xf32>
    %c0_36 = arith.constant 0 : index
    %c0_37 = arith.constant 0 : index
    %c0_38 = arith.constant 0 : index
    %57 = vector.load %arg5[%c0_36, %c0_37, %c0_38] : memref<1x64x1xf32, #tpu.memory_space<vmem>>, vector<1x64x1xf32>
    %58 = vector.shape_cast %57 : vector<1x64x1xf32> to vector<64x1xf32>
    %59 = vector.shape_cast %56 : vector<64x1xf32> to vector<1x64x1xf32>
    tpu.vector_store %arg5[%c0_36, %c0_37, %c0_38], %59 {strides = array<i32>} : memref<1x64x1xf32, #tpu.memory_space<vmem>>, vector<1x64x1xf32>,
    %60 = arith.mulf %54, %47 : vector<64x384xf32>
    %cst_39 = arith.constant dense<0.000000e+00> : vector<64xf32>
    %61 = vector.multi_reduction <add>, %60, %cst_39 [1] : vector<64x384xf32> to vector<64xf32>
    %62 = vector.shape_cast %61 : vector<64xf32> to vector<64x1xf32>
    %c0_40 = arith.constant 0 : index
    %c0_41 = arith.constant 0 : index
    %c0_42 = arith.constant 0 : index
    %63 = vector.load %arg6[%c0_40, %c0_41, %c0_42] : memref<1x64x1xf32, #tpu.memory_space<vmem>>, vector<1x64x1xf32>
    %64 = vector.shape_cast %63 : vector<1x64x1xf32> to vector<64x1xf32>
    %65 = vector.shape_cast %62 : vector<64x1xf32> to vector<1x64x1xf32>
    tpu.vector_store %arg6[%c0_40, %c0_41, %c0_42], %65 {strides = array<i32>} : memref<1x64x1xf32, #tpu.memory_space<vmem>>, vector<1x64x1xf32>,
    return
  }
  func.func @transform_0(%arg0: i32) -> (i32, i32, i32) {
    %c0_i32 = arith.constant 0 : i32
    %c0_i32_0 = arith.constant 0 : i32
    %c0_i32_1 = arith.constant 0 : i32
    return %arg0, %c0_i32, %c0_i32_0 : i32, i32, i32
  }
  func.func @transform_1(%arg0: i32) -> (i32, i32, i32) {
    %c0_i32 = arith.constant 0 : i32
    %c0_i32_0 = arith.constant 0 : i32
    %c0_i32_1 = arith.constant 0 : i32
    %c0_i32_2 = arith.constant 0 : i32
    return %c0_i32, %c0_i32_0, %c0_i32_1 : i32, i32, i32
  }
  func.func @transform_2(%arg0: i32) -> (i32, i32) {
    %c0_i32 = arith.constant 0 : i32
    %c0_i32_0 = arith.constant 0 : i32
    %c0_i32_1 = arith.constant 0 : i32
    return %c0_i32, %c0_i32_0 : i32, i32
  }
  func.func @transform_3(%arg0: i32) -> (i32, i32, i32) {
    %c0_i32 = arith.constant 0 : i32
    %c0_i32_0 = arith.constant 0 : i32
    %c0_i32_1 = arith.constant 0 : i32
    return %arg0, %c0_i32, %c0_i32_0 : i32, i32, i32
  }
  func.func @transform_4(%arg0: i32) -> (i32, i32, i32) {
    %c0_i32 = arith.constant 0 : i32
    %c0_i32_0 = arith.constant 0 : i32
    %c0_i32_1 = arith.constant 0 : i32
    return %arg0, %c0_i32, %c0_i32_0 : i32, i32, i32
  }
  func.func @transform_5(%arg0: i32) -> (i32, i32, i32) {
    %c0_i32 = arith.constant 0 : i32
    %c0_i32_0 = arith.constant 0 : i32
    %c0_i32_1 = arith.constant 0 : i32
    return %arg0, %c0_i32, %c0_i32_0 : i32, i32, i32
  }
}

module attributes {stable_mosaic.version = 11 : i64} {
  func.func @_bn_relu_att_kernel(%arg0: i32, %arg1: memref<1x64x384xbf16, #tpu.memory_space<vmem>>, %arg2: memref<64x1xf32, #tpu.memory_space<vmem>>, %arg3: memref<64x1xf32, #tpu.memory_space<vmem>>, %arg4: memref<1x64x1xf32, #tpu.memory_space<vmem>>, %arg5: memref<1x64x384xf32, #tpu.memory_space<vmem>>) attributes {dimension_semantics = [#tpu.dimension_semantics<parallel>], iteration_bounds = array<i64: 2>, scalar_prefetch = 0 : i64, scratch_operands = 0 : i64, tpu.core_type = #tpu.core_type<tc>, window_params = [{transform_indices = @transform_0, window_bounds = array<i64: 1, 64, 384>}, {pipeline_mode = #tpu.pipeline_mode<synchronous>, transform_indices = @transform_1, window_bounds = array<i64: 64, 1>}, {pipeline_mode = #tpu.pipeline_mode<synchronous>, transform_indices = @transform_2, window_bounds = array<i64: 64, 1>}, {transform_indices = @transform_3, window_bounds = array<i64: 1, 64, 1>}, {transform_indices = @transform_4, window_bounds = array<i64: 1, 64, 384>}]} {
    %c0 = arith.constant 0 : index
    %c0_0 = arith.constant 0 : index
    %c0_1 = arith.constant 0 : index
    %0 = vector.load %arg1[%c0, %c0_0, %c0_1] : memref<1x64x384xbf16, #tpu.memory_space<vmem>>, vector<1x64x384xbf16>
    %1 = vector.shape_cast %0 : vector<1x64x384xbf16> to vector<64x384xbf16>
    %2 = arith.extf %1 : vector<64x384xbf16> to vector<64x384xf32>
    %c0_2 = arith.constant 0 : index
    %c0_3 = arith.constant 0 : index
    %3 = vector.load %arg2[%c0_2, %c0_3] : memref<64x1xf32, #tpu.memory_space<vmem>>, vector<64x1xf32>
    %4 = vector.broadcast %3 : vector<64x1xf32> to vector<64x384xf32>
    %5 = arith.mulf %2, %4 : vector<64x384xf32>
    %c0_4 = arith.constant 0 : index
    %c0_5 = arith.constant 0 : index
    %6 = vector.load %arg3[%c0_4, %c0_5] : memref<64x1xf32, #tpu.memory_space<vmem>>, vector<64x1xf32>
    %7 = vector.broadcast %6 : vector<64x1xf32> to vector<64x384xf32>
    %8 = arith.addf %5, %7 : vector<64x384xf32>
    %cst = arith.constant 0.000000e+00 : f32
    %9 = vector.broadcast %cst : f32 to vector<64x384xf32>
    %10 = arith.maximumf %8, %9 : vector<64x384xf32>
    %c0_6 = arith.constant 0 : index
    %c0_7 = arith.constant 0 : index
    %c0_8 = arith.constant 0 : index
    %11 = vector.load %arg4[%c0_6, %c0_7, %c0_8] : memref<1x64x1xf32, #tpu.memory_space<vmem>>, vector<1x64x1xf32>
    %12 = vector.shape_cast %11 : vector<1x64x1xf32> to vector<64x1xf32>
    %13 = vector.broadcast %12 : vector<64x1xf32> to vector<64x384xf32>
    %14 = arith.mulf %10, %13 : vector<64x384xf32>
    %c0_9 = arith.constant 0 : index
    %c0_10 = arith.constant 0 : index
    %c0_11 = arith.constant 0 : index
    %15 = vector.load %arg5[%c0_9, %c0_10, %c0_11] : memref<1x64x384xf32, #tpu.memory_space<vmem>>, vector<1x64x384xf32>
    %16 = vector.shape_cast %15 : vector<1x64x384xf32> to vector<64x384xf32>
    %17 = vector.shape_cast %14 : vector<64x384xf32> to vector<1x64x384xf32>
    tpu.vector_store %arg5[%c0_9, %c0_10, %c0_11], %17 {strides = array<i32>} : memref<1x64x384xf32, #tpu.memory_space<vmem>>, vector<1x64x384xf32>,
    return
  }
  func.func @transform_0(%arg0: i32) -> (i32, i32, i32) {
    %c0_i32 = arith.constant 0 : i32
    %c0_i32_0 = arith.constant 0 : i32
    %c0_i32_1 = arith.constant 0 : i32
    return %arg0, %c0_i32, %c0_i32_0 : i32, i32, i32
  }
  func.func @transform_1(%arg0: i32) -> (i32, i32) {
    %c0_i32 = arith.constant 0 : i32
    %c0_i32_0 = arith.constant 0 : i32
    %c0_i32_1 = arith.constant 0 : i32
    return %c0_i32, %c0_i32_0 : i32, i32
  }
  func.func @transform_2(%arg0: i32) -> (i32, i32) {
    %c0_i32 = arith.constant 0 : i32
    %c0_i32_0 = arith.constant 0 : i32
    %c0_i32_1 = arith.constant 0 : i32
    return %c0_i32, %c0_i32_0 : i32, i32
  }
  func.func @transform_3(%arg0: i32) -> (i32, i32, i32) {
    %c0_i32 = arith.constant 0 : i32
    %c0_i32_0 = arith.constant 0 : i32
    %c0_i32_1 = arith.constant 0 : i32
    return %arg0, %c0_i32, %c0_i32_0 : i32, i32, i32
  }
  func.func @transform_4(%arg0: i32) -> (i32, i32, i32) {
    %c0_i32 = arith.constant 0 : i32
    %c0_i32_0 = arith.constant 0 : i32
    %c0_i32_1 = arith.constant 0 : i32
    return %arg0, %c0_i32, %c0_i32_0 : i32, i32, i32
  }
}

module attributes {stable_mosaic.version = 11 : i64} {
  func.func @_bn_relu_pool_kernel(%arg0: i32, %arg1: memref<1x64x384xbf16, #tpu.memory_space<vmem>>, %arg2: memref<64x1xf32, #tpu.memory_space<vmem>>, %arg3: memref<64x1xf32, #tpu.memory_space<vmem>>, %arg4: memref<1x384xf32, #tpu.memory_space<vmem>>, %arg5: memref<1x64x1xf32, #tpu.memory_space<vmem>>) attributes {dimension_semantics = [#tpu.dimension_semantics<parallel>], iteration_bounds = array<i64: 2>, scalar_prefetch = 0 : i64, scratch_operands = 0 : i64, tpu.core_type = #tpu.core_type<tc>, window_params = [{transform_indices = @transform_0, window_bounds = array<i64: 1, 64, 384>}, {pipeline_mode = #tpu.pipeline_mode<synchronous>, transform_indices = @transform_1, window_bounds = array<i64: 64, 1>}, {pipeline_mode = #tpu.pipeline_mode<synchronous>, transform_indices = @transform_2, window_bounds = array<i64: 64, 1>}, {pipeline_mode = #tpu.pipeline_mode<synchronous>, transform_indices = @transform_3, window_bounds = array<i64: 1, 384>}, {transform_indices = @transform_4, window_bounds = array<i64: 1, 64, 1>}]} {
    %c0 = arith.constant 0 : index
    %c0_0 = arith.constant 0 : index
    %c0_1 = arith.constant 0 : index
    %0 = vector.load %arg1[%c0, %c0_0, %c0_1] : memref<1x64x384xbf16, #tpu.memory_space<vmem>>, vector<1x64x384xbf16>
    %1 = vector.shape_cast %0 : vector<1x64x384xbf16> to vector<64x384xbf16>
    %2 = arith.extf %1 : vector<64x384xbf16> to vector<64x384xf32>
    %c0_2 = arith.constant 0 : index
    %c0_3 = arith.constant 0 : index
    %3 = vector.load %arg2[%c0_2, %c0_3] : memref<64x1xf32, #tpu.memory_space<vmem>>, vector<64x1xf32>
    %4 = vector.broadcast %3 : vector<64x1xf32> to vector<64x384xf32>
    %5 = arith.mulf %2, %4 : vector<64x384xf32>
    %c0_4 = arith.constant 0 : index
    %c0_5 = arith.constant 0 : index
    %6 = vector.load %arg3[%c0_4, %c0_5] : memref<64x1xf32, #tpu.memory_space<vmem>>, vector<64x1xf32>
    %7 = vector.broadcast %6 : vector<64x1xf32> to vector<64x384xf32>
    %8 = arith.addf %5, %7 : vector<64x384xf32>
    %cst = arith.constant 0.000000e+00 : f32
    %9 = vector.broadcast %cst : f32 to vector<64x384xf32>
    %10 = arith.maximumf %8, %9 : vector<64x384xf32>
    %c0_6 = arith.constant 0 : index
    %c0_7 = arith.constant 0 : index
    %11 = vector.load %arg4[%c0_6, %c0_7] : memref<1x384xf32, #tpu.memory_space<vmem>>, vector<1x384xf32>
    %12 = vector.broadcast %11 : vector<1x384xf32> to vector<64x384xf32>
    %13 = arith.mulf %10, %12 : vector<64x384xf32>
    %cst_8 = arith.constant dense<0.000000e+00> : vector<64xf32>
    %14 = vector.multi_reduction <add>, %13, %cst_8 [1] : vector<64x384xf32> to vector<64xf32>
    %15 = vector.shape_cast %14 : vector<64xf32> to vector<64x1xf32>
    %c0_9 = arith.constant 0 : index
    %c0_10 = arith.constant 0 : index
    %c0_11 = arith.constant 0 : index
    %16 = vector.load %arg5[%c0_9, %c0_10, %c0_11] : memref<1x64x1xf32, #tpu.memory_space<vmem>>, vector<1x64x1xf32>
    %17 = vector.shape_cast %16 : vector<1x64x1xf32> to vector<64x1xf32>
    %18 = vector.shape_cast %15 : vector<64x1xf32> to vector<1x64x1xf32>
    tpu.vector_store %arg5[%c0_9, %c0_10, %c0_11], %18 {strides = array<i32>} : memref<1x64x1xf32, #tpu.memory_space<vmem>>, vector<1x64x1xf32>,
    return
  }
  func.func @transform_0(%arg0: i32) -> (i32, i32, i32) {
    %c0_i32 = arith.constant 0 : i32
    %c0_i32_0 = arith.constant 0 : i32
    %c0_i32_1 = arith.constant 0 : i32
    return %arg0, %c0_i32, %c0_i32_0 : i32, i32, i32
  }
  func.func @transform_1(%arg0: i32) -> (i32, i32) {
    %c0_i32 = arith.constant 0 : i32
    %c0_i32_0 = arith.constant 0 : i32
    %c0_i32_1 = arith.constant 0 : i32
    return %c0_i32, %c0_i32_0 : i32, i32
  }
  func.func @transform_2(%arg0: i32) -> (i32, i32) {
    %c0_i32 = arith.constant 0 : i32
    %c0_i32_0 = arith.constant 0 : i32
    %c0_i32_1 = arith.constant 0 : i32
    return %c0_i32, %c0_i32_0 : i32, i32
  }
  func.func @transform_3(%arg0: i32) -> (i32, i32) {
    %c0_i32 = arith.constant 0 : i32
    %c0_i32_0 = arith.constant 0 : i32
    %c0_i32_1 = arith.constant 0 : i32
    return %c0_i32, %c0_i32_0 : i32, i32
  }
  func.func @transform_4(%arg0: i32) -> (i32, i32, i32) {
    %c0_i32 = arith.constant 0 : i32
    %c0_i32_0 = arith.constant 0 : i32
    %c0_i32_1 = arith.constant 0 : i32
    return %arg0, %c0_i32, %c0_i32_0 : i32, i32, i32
  }
}

</mosaic_0001>

<bundles_post_ra>
// kernel: arm_forward.4
= control target key start
LH: loop header
LB: loop body
LE: loop exit
PB: predicated region body
PF: predicated region fallthrough
CT: control target
= control target key end

     0   :  { %s600_s15 = smov 0   ;;  %s728_s0 = inlined_call_operand.vmem [shape: bf16[2,64,384], index: 0, kind: input, shape index: {}]   ;;  %s729_s1 = inlined_call_operand.vmem [shape: f32[64,1], index: 1, kind: input, shape index: {}]   ;;  %s730_s2 = inlined_call_operand.vmem [shape: f32[64,1], index: 2, kind: input, shape index: {}]   ;;  %s731_s3 = inlined_call_operand.vmem [shape: f32[1,384], index: 3, kind: input, shape index: {}]   ;;  %s732_s4 = inlined_call_operand.vmem [shape: f32[2,64,1], index: 4, kind: output, shape index: {}]  }
   0x1 LB: > { %s543_s16 = sadd.s32 4294967295, %s572_s15   ;;  %p547_p0 = scmp.ge.s32.totalorder %s572_s15, 1  ;;  %s572_s15 = sphi %s600_s15, %s14_s15  }
   0x2   : > { %p162_p1 = scmp.lt.s32.totalorder %s572_s15, 3 }
   0x4   : > { %p163_p2 = pnand %p547_p0, %p162_p1 }
   0x5   : > { %v240_v0 = vld [vmem:[%s729_s1 + $0x10] sm:$0xff] (!%p163_p2)  ;;  %v238_v1 = vld [vmem:[%s729_s1] sm:$0xff] (!%p163_p2)  ;;  %v574_v2 = vmov (!%p163_p2), 0   ;;  %v241_v3 = vld [vmem:[%s729_s1 + $0x18] sm:$0xff] (!%p163_p2)  ;;  %p188_p3 = scmp.lt.s32.totalorder (!%p163_p2), %s543_s16, 1  ;;  %v408_v19 = vlaneseq (!%p163_p2)  ;;  %vm479_vm0 = vcmask (!%p163_p2), 7168  }
   0x6   : > { %166 = sbr.rel (%p163_p2) target bundleno = 326 (0x146), region = 36  ;;  %565 = vset.pattern.permute.xlu1 (!%p163_p2), %v574_v2  ;;  %564 = vset.pattern.permute.xlu0 (!%p163_p2), %v574_v2  ;;  %v239_v4 = vld [vmem:[%s729_s1 + $0x8] sm:$0xff] (!%p163_p2)  ;;  %v242_v6 = vld [vmem:[%s729_s1 + $0x20] sm:$0xff] (!%p163_p2)  ;;  %v245_v7 = vld [vmem:[%s729_s1 + $0x38] sm:$0xff] (!%p163_p2) }
   0x7   : > { %258 = vperm.xlu1 (!%p163_p2), %565, %v240_v0   ;;  %248 = vperm.xlu0 (!%p163_p2), %564, %v238_v1   ;;  %v243_v5 = vld [vmem:[%s729_s1 + $0x28] sm:$0xff] (!%p163_p2)  ;;  %v244_v8 = vld [vmem:[%s729_s1 + $0x30] sm:$0xff] (!%p163_p2)  ;;  %v310_v10 = vld [vmem:[%s730_s2] sm:$0xff] (!%p163_p2)  ;;  %v409_v27 = vshrl.u32 (!%p163_p2), %v408_v19, 7 }
   0x8   : > { %v311_v9 = vld [vmem:[%s730_s2 + $0x8] sm:$0xff] (!%p163_p2)  ;;  %v313_v11 = vld [vmem:[%s730_s2 + $0x18] sm:$0xff] (!%p163_p2)  ;;  %v312_v12 = vld [vmem:[%s730_s2 + $0x10] sm:$0xff] (!%p163_p2) }
   0x9   : > { %v315_v13 = vld [vmem:[%s730_s2 + $0x28] sm:$0xff] (!%p163_p2)  ;;  %v314_v14 = vld [vmem:[%s730_s2 + $0x20] sm:$0xff] (!%p163_p2)  ;;  %v317_v15 = vld [vmem:[%s730_s2 + $0x38] sm:$0xff] (!%p163_p2)  ;;  %v410_v48 = vsub.s32 (!%p163_p2), 0, %v409_v27  ;;  %v414_v49 = vsub.s32 (!%p163_p2), 1, %v409_v27  ;;  %v418_v54 = vsub.s32 (!%p163_p2), 2, %v409_v27 }
   0xa   : > { %v316_v16 = vld [vmem:[%s730_s2 + $0x30] sm:$0xff] (!%p163_p2)  ;;  %v406_v53 = vld [vmem:[%s731_s3] sm:$0x7] (!%p163_p2) }
   0xb   : > { %263 = vperm.xlu1 (!%p163_p2), %565, %v241_v3   ;;  %253 = vperm.xlu0 (!%p163_p2), %564, %v239_v4   ;;  %v677_v3 = vrot.slane (!%p163_p2), %v406_v53, %v410_v48  ;;  %v679_v4 = vrot.slane (!%p163_p2), %v406_v53, %v414_v49 }
   0xd   : > { %s734_s16 = smov (!%p188_p3, %s543_s16), 1 }
   0xe   : > { %s554_s25 = smul.u32 96, %s734_s16  ;;  %s553_s5 = sshll.u32 %s734_s16, 6 }
   0xf   : > { %273 = vperm.xlu1 %565, %v243_v5   ;;  %268 = vperm.xlu0 %564, %v242_v6   ;;  %s197_s8 = scalar_lea.vmem %s732_s4, %s553_s5 }
  0x10   : > { %s192_s28 = scalar_lea.vmem %s728_s0, %s554_s25 }
  0x11   : > { %v202_v20 = vld [vmem:[%s192_s28 + $0x18] sm:$0xff]  ;;  %v198_v21 = vld [vmem:[%s192_s28] sm:$0xff]  ;;  %v205_v25 = vld [vmem:[%s192_s28 + $0x14] ss:$24 sps:$4 sm:$0xff]  }
  0x12   : > { %v203_v22 = vld [vmem:[%s192_s28 + $0x8] ss:$24 sps:$4 sm:$0xff]   ;;  %v220_v28 = vunpack.c.l.bf16 %v202_v20  ;;  %v200_v29 = vld [vmem:[%s192_s28 + $0xc] sm:$0xff]  ;;  %v221_v30 = vunpack.c.h.bf16 %v202_v20  ;;  %v214_v32 = vunpack.c.l.bf16 %v198_v21  ;;  %v215_v33 = vunpack.c.h.bf16 %v198_v21  ;;  %v209_v39 = vld [vmem:[%s192_s28 + $0x38] ss:$12 sps:$4 sm:$0xff]  }
  0x13   : > { %283 = vperm.xlu1 %565, %v245_v7   ;;  %278 = vperm.xlu0 %564, %v244_v8   ;;  %v204_v24 = vld [vmem:[%s192_s28 + $0x24] sm:$0xff]  ;;  %v222_v31 = vunpack.c.h.bf16 %v203_v22  ;;  %v208_v34 = vld [vmem:[%s192_s28 + $0x3c] sm:$0xff]  ;;  %v216_v35 = vunpack.c.l.bf16 %v203_v22  ;;  %v225_v38 = vunpack.c.h.bf16 %v205_v25  ;;  %v206_v40 = vld [vmem:[%s192_s28 + $0x30] sm:$0xff]  ;;  %v217_v41 = vunpack.c.l.bf16 %v200_v29 }
  0x14   : > { %v223_v36 = vunpack.c.l.bf16 %v204_v24  ;;  %v224_v37 = vunpack.c.h.bf16 %v204_v24  ;;  %v218_v42 = vunpack.c.h.bf16 %v200_v29  ;;  %v212_v45 = vld [vmem:[%s192_s28 + $0x54] sm:$0xff]  ;;  %v666_v46 = vld [vmem:[%s192_s28 + $0x50] ss:$12 sps:$4 sm:$0xff]   ;;  %v668_v47 = vld [vmem:[%s192_s28 + $0x48] sm:$0xff]  ;;  %v219_v50 = vunpack.c.l.bf16 %v205_v25 }
  0x15   : > { %v229_v51 = vunpack.c.l.bf16 %v208_v34  ;;  %v230_v52 = vunpack.c.h.bf16 %v208_v34  ;;  %v231_v55 = vunpack.c.h.bf16 %v209_v39  ;;  %v226_v56 = vunpack.c.l.bf16 %v206_v40 }
  0x16   : > { %v227_v57 = vunpack.c.h.bf16 %v206_v40  ;;  %v228_v58 = vunpack.c.l.bf16 %v209_v39  ;;  %v235_v59 = vunpack.c.l.bf16 %v212_v45  ;;  %v236_v60 = vunpack.c.h.bf16 %v212_v45 }
  0x17   : > { %325 = vperm.xlu1 %565, %v311_v9   ;;  %320 = vperm.xlu0 %564, %v310_v10   ;;  %v237_v61 = vunpack.c.h.bf16 %v666_v46  ;;  %v232_v62 = vunpack.c.l.bf16 %v668_v47  ;;  %v233_v1 = vunpack.c.h.bf16 %v668_v47  ;;  %v234_v2 = vunpack.c.l.bf16 %v666_v46 }
  0x18   : > { %v681_v8 = vrot.slane %v406_v53, %v418_v54 }
  0x1b   : > { %335 = vperm.xlu1 %565, %v313_v11   ;;  %330 = vperm.xlu0 %564, %v312_v12  }
  0x1f   : > { %345 = vperm.xlu1 %565, %v315_v13   ;;  %340 = vperm.xlu0 %564, %v314_v14  }
  0x23   : > { %355 = vperm.xlu1 %565, %v317_v15   ;;  %350 = vperm.xlu0 %564, %v316_v16  }
  0x86   : > { %v259_v17 = vpop.permute.xlu1 %258  ;;  %v249_v18 = vpop.permute.xlu0 %248 }
  0x87   : > { %v292_v5 = vmul.f32 %v259_v17, %v220_v28  ;;  %v293_v6 = vmul.f32 %v259_v17, %v221_v30  ;;  %v294_v7 = vmul.f32 %v259_v17, %v222_v31  ;;  %v286_v9 = vmul.f32 %v249_v18, %v214_v32 }
  0x88   : > { %v287_v10 = vmul.f32 %v249_v18, %v215_v33  ;;  %v288_v11 = vmul.f32 %v249_v18, %v216_v35 }
  0x8a   : > { %v264_v23 = vpop.permute.xlu1 %263  ;;  %v254_v26 = vpop.permute.xlu0 %253 }
  0x8b   : > { %v295_v12 = vmul.f32 %v264_v23, %v223_v36  ;;  %v296_v13 = vmul.f32 %v264_v23, %v224_v37  ;;  %v289_v14 = vmul.f32 %v254_v26, %v217_v41  ;;  %v290_v15 = vmul.f32 %v254_v26, %v218_v42 }
  0x8c   : > { %v291_v16 = vmul.f32 %v254_v26, %v219_v50  ;;  %v297_v19 = vmul.f32 %v264_v23, %v225_v38 }
  0x8e   : > { %v274_v43 = vpop.permute.xlu1 %273  ;;  %v269_v44 = vpop.permute.xlu0 %268 }
  0x8f   : > { %v301_v20 = vmul.f32 %v274_v43, %v229_v51  ;;  %v302_v21 = vmul.f32 %v274_v43, %v230_v52  ;;  %v303_v22 = vmul.f32 %v274_v43, %v231_v55  ;;  %v298_v27 = vmul.f32 %v269_v44, %v226_v56 }
  0x90   : > { %v299_v30 = vmul.f32 %v269_v44, %v227_v57  ;;  %v300_v31 = vmul.f32 %v269_v44, %v228_v58 }
  0x92   : > { %v284_v63 = vpop.permute.xlu1 %283  ;;  %v279_v0 = vpop.permute.xlu0 %278 }
  0x93   : > { %v307_v32 = vmul.f32 %v284_v63, %v235_v59  ;;  %v308_v18 = vmul.f32 %v284_v63, %v236_v60  ;;  %v683_v37 = vmul.f32 %v284_v63, %v237_v61  ;;  %v304_v23 = vmul.f32 %v279_v0, %v232_v62 }
  0x94   : > { %v305_v49 = vmul.f32 %v279_v0, %v233_v1  ;;  %v306_v50 = vmul.f32 %v279_v0, %v234_v2 }
  0x96   : > { %v326_v24 = vpop.permute.xlu1 %325  ;;  %v321_v25 = vpop.permute.xlu0 %320 }
  0x97   : > { %v361_v28 = vadd.f32 %v326_v24, %v289_v14  ;;  %v362_v29 = vadd.f32 %v326_v24, %v290_v15  ;;  %v363_v17 = vadd.f32 %v326_v24, %v291_v16  ;;  %v358_v33 = vadd.f32 %v321_v25, %v286_v9 }
  0x98   : > { %v359_v36 = vadd.f32 %v321_v25, %v287_v10  ;;  %v360_v38 = vadd.f32 %v321_v25, %v288_v11 }
  0x99   : > { %v385_v34 = vmax.f32 %v361_v28, 0.0  ;;  %v386_v35 = vmax.f32 %v362_v29, 0.0  ;;  %v387_v26 = vmax.f32 %v363_v17, 0.0  ;;  %v382_v46 = vmax.f32 %v358_v33, 0.0 }
  0x9a   : > { %v336_v39 = vpop.permute.xlu1 %335  ;;  %v331_v40 = vpop.permute.xlu0 %330  ;;  %v383_v51 = vmax.f32 %v359_v36, 0.0  ;;  %v384_v53 = vmax.f32 %v360_v38, 0.0 }
  0x9b   : > { %v367_v41 = vadd.f32 %v336_v39, %v295_v12  ;;  %v368_v42 = vadd.f32 %v336_v39, %v296_v13  ;;  %v685_v43 = vadd.f32 %v336_v39, %v297_v19  ;;  %v364_v45 = vadd.f32 %v331_v40, %v292_v5 }
  0x9c   : > { %v365_v44 = vadd.f32 %v331_v40, %v293_v6  ;;  %v426_v47 = vmul.f32 %v677_v3, %v385_v34  ;;  %v427_v48 = vmul.f32 %v679_v4, %v386_v35  ;;  %v366_v52 = vadd.f32 %v331_v40, %v294_v7 }
  0x9d   : > { %v391_v54 = vmax.f32 %v367_v41, 0.0  ;;  %v428_v57 = vmul.f32 %v681_v8, %v387_v26  ;;  %v392_v59 = vmax.f32 %v368_v42, 0.0  ;;  %v393_v60 = vmax.f32 %v685_v43, 0.0 }
  0x9e   : > { %v346_v55 = vpop.permute.xlu1 %345  ;;  %v341_v56 = vpop.permute.xlu0 %340  ;;  %v451_v58 = vadd.f32 %v427_v48, %v426_v47  ;;  %v388_v61 = vmax.f32 %v364_v45, 0.0  ;;  %v389_v63 = vmax.f32 %v365_v44, 0.0  ;;  %v423_v1 = vmul.f32 %v677_v3, %v382_v46 }
  0x9f   : > { %v370_v62 = vadd.f32 %v341_v56, %v298_v27  ;;  %v371_v5 = vadd.f32 %v341_v56, %v299_v30  ;;  %v390_v0 = vmax.f32 %v366_v52, 0.0  ;;  %v373_v2 = vadd.f32 %v346_v55, %v301_v20 }
  0xa0   : > { %v452_v6 = vadd.f32 %v451_v58, %v428_v57  ;;  %v374_v7 = vadd.f32 %v346_v55, %v302_v21  ;;  %v372_v9 = vadd.f32 %v341_v56, %v300_v31  ;;  %v375_v10 = vadd.f32 %v346_v55, %v303_v22 }
  0xa1   : > { %v394_v11 = vmax.f32 %v370_v62, 0.0  ;;  %v395_v12 = vmax.f32 %v371_v5, 0.0  ;;  %v424_v13 = vmul.f32 %v679_v4, %v383_v51  ;;  %v425_v16 = vmul.f32 %v681_v8, %v384_v53 }
  0xa2   : > { %453 = vadd.xlane.f32.xlu1 %v452_v6  ;;  %v356_v14 = vpop.permute.xlu1 %355  ;;  %v351_v15 = vpop.permute.xlu0 %350  ;;  %v429_v20 = vmul.f32 %v677_v3, %v388_v61  ;;  %v397_v21 = vmax.f32 %v373_v2, 0.0  ;;  %v398_v17 = vmax.f32 %v374_v7, 0.0  ;;  %v396_v22 = vmax.f32 %v372_v9, 0.0 }
  0xa3   : > { %v379_v19 = vadd.f32 %v356_v14, %v307_v32  ;;  %v380_v24 = vadd.f32 %v356_v14, %v308_v18  ;;  %v376_v25 = vadd.f32 %v351_v15, %v304_v23  ;;  %v447_v27 = vadd.f32 %v424_v13, %v423_v1 }
  0xa4   : > { %v377_v28 = vadd.f32 %v351_v15, %v305_v49  ;;  %v378_v29 = vadd.f32 %v351_v15, %v306_v50  ;;  %v430_v35 = vmul.f32 %v679_v4, %v389_v63  ;;  %v435_v32 = vmul.f32 %v677_v3, %v394_v11 }
  0xa5   : > { %v400_v30 = vmax.f32 %v376_v25, 0.0  ;;  %v448_v31 = vadd.f32 %v447_v27, %v425_v16  ;;  %v403_v33 = vmax.f32 %v379_v19, 0.0  ;;  %v404_v36 = vmax.f32 %v380_v24, 0.0 }
  0xa6   : > { %v401_v34 = vmax.f32 %v377_v28, 0.0  ;;  %v402_v26 = vmax.f32 %v378_v29, 0.0  ;;  %v436_v18 = vmul.f32 %v679_v4, %v395_v12  ;;  %v431_v23 = vmul.f32 %v681_v8, %v390_v0 }
  0xa7   : > { %449 = vadd.xlane.f32.xlu0 %v448_v31  ;;  %v455_v38 = vadd.f32 %v430_v35, %v429_v20  ;;  %v432_v39 = vmul.f32 %v677_v3, %v391_v54  ;;  %v433_v40 = vmul.f32 %v679_v4, %v392_v59  ;;  %v437_v41 = vmul.f32 %v681_v8, %v396_v22 }
  0xa8   : > { %v463_v42 = vadd.f32 %v436_v18, %v435_v32  ;;  %v441_v43 = vmul.f32 %v677_v3, %v400_v30  ;;  %v442_v45 = vmul.f32 %v679_v4, %v401_v34  ;;  %v438_v47 = vmul.f32 %v677_v3, %v397_v21 }
  0xa9   : > { %v456_v46 = vadd.f32 %v455_v38, %v431_v23  ;;  %v459_v44 = vadd.f32 %v433_v40, %v432_v39  ;;  %v439_v48 = vmul.f32 %v679_v4, %v398_v17  ;;  %v443_v50 = vmul.f32 %v681_v8, %v402_v26 }
  0xaa   : > { %v464_v49 = vadd.f32 %v463_v42, %v437_v41  ;;  %v471_v51 = vadd.f32 %v442_v45, %v441_v43  ;;  %v399_v52 = vmax.f32 %v375_v10, 0.0  ;;  %v381_v53 = vadd.f32 %v356_v14, %v683_v37 }
  0xab   : > { %457 = vadd.xlane.f32.xlu0 %v456_v46  ;;  %v434_v54 = vmul.f32 %v681_v8, %v393_v60  ;;  %v467_v57 = vadd.f32 %v439_v48, %v438_v47  ;;  %v444_v58 = vmul.f32 %v677_v3, %v403_v33  ;;  %v445_v59 = vmul.f32 %v679_v4, %v404_v36 }
  0xac   : > { %465 = vadd.xlane.f32.xlu1 %v464_v49  ;;  %v472_v55 = vadd.f32 %v471_v51, %v443_v50  ;;  %v405_v61 = vmax.f32 %v381_v53, 0.0  ;;  %v440_v62 = vmul.f32 %v681_v8, %v399_v52 }
  0xad   : > { %v460_v56 = vadd.f32 %v459_v44, %v434_v54  ;;  %v475_v5 = vadd.f32 %v445_v59, %v444_v58 }
  0xae   : > { %v468_v63 = vadd.f32 %v467_v57, %v440_v62  ;;  %v446_v37 = vmul.f32 %v681_v8, %v405_v61 }
  0xaf   : > { %461 = vadd.xlane.f32.xlu0 %v460_v56 }
  0xb0   : > { %473 = vadd.xlane.f32.xlu1 %v472_v55  ;;  %v476_v60 = vadd.f32 %v475_v5, %v446_v37 }
  0xb3   : > { %469 = vadd.xlane.f32.xlu0 %v468_v63 }
  0xb7   : > { %477 = vadd.xlane.f32.xlu0 %v476_v60 }
 0x12f   : > { %v454_v3 = vpop.xlane.xlu1 %453 }
 0x130   : > { %481 = vst.msk [vmem:[%s197_s8 + $0x8] sm:$0xff] %vm479_vm0, %v454_v3 }
 0x134   : > { %v450_v4 = vpop.xlane.xlu0 %449 }
 0x135   : > { %480 = vst.msk [vmem:[%s197_s8] sm:$0xff] %vm479_vm0, %v450_v4 }
 0x138   : > { %v458_v6 = vpop.xlane.xlu0 %457 }
 0x139   : > { %482 = vst.msk [vmem:[%s197_s8 + $0x10] sm:$0xff] %vm479_vm0, %v458_v6  ;;  %v466_v1 = vpop.xlane.xlu1 %465 }
 0x13a   : > { %484 = vst.msk [vmem:[%s197_s8 + $0x20] sm:$0xff] %vm479_vm0, %v466_v1 }
 0x13c   : > { %v462_v8 = vpop.xlane.xlu0 %461 }
 0x13d   : > { %483 = vst.msk [vmem:[%s197_s8 + $0x18] sm:$0xff] %vm479_vm0, %v462_v8  ;;  %v474_v0 = vpop.xlane.xlu1 %473 }
 0x13e   : > { %486 = vst.msk [vmem:[%s197_s8 + $0x30] sm:$0xff] %vm479_vm0, %v474_v0 }
 0x140   : > { %v470_v2 = vpop.xlane.xlu0 %469 }
 0x141   : > { %485 = vst.msk [vmem:[%s197_s8 + $0x28] sm:$0xff] %vm479_vm0, %v470_v2 }
 0x144   : > { %v478_v7 = vpop.xlane.xlu0 %477 }
 0x145   : > { %487 = vst.msk [vmem:[%s197_s8 + $0x38] sm:$0xff] %vm479_vm0, %v478_v7 }
 0x146 PF: > { %s14_s15 = sadd.s32 1, %s572_s15  }
 0x147   : > { %p11_p4 = scmp.ge.s32.totalorder %s14_s15, 4  }
 0x149   :  { %13 = sbr.rel (!%p11_p4) target bundleno = 1 (0x1), region = 66 }

// kernel: arm_forward.5
= control target key start
LH: loop header
LB: loop body
LE: loop exit
PB: predicated region body
PF: predicated region fallthrough
CT: control target
= control target key end

     0   :  { %s648_s15 = smov 0   ;;  %s771_s0 = inlined_call_operand.vmem [shape: bf16[2,64,384], index: 0, kind: input, shape index: {}]   ;;  %s772_s1 = inlined_call_operand.vmem [shape: f32[64,1], index: 1, kind: input, shape index: {}]   ;;  %s773_s2 = inlined_call_operand.vmem [shape: f32[64,1], index: 2, kind: input, shape index: {}]   ;;  %s774_s3 = inlined_call_operand.vmem [shape: f32[2,64,1], index: 3, kind: input, shape index: {}]   ;;  %s775_s4 = inlined_call_operand.vmem [shape: f32[2,64,384], index: 4, kind: output, shape index: {}]  }
   0x1 LB: > { %s589_s16 = sadd.s32 4294967295, %s620_s15   ;;  %p593_p0 = scmp.ge.s32.totalorder %s620_s15, 1  ;;  %s620_s15 = sphi %s648_s15, %s14_s15  }
   0x2   : > { %p172_p1 = scmp.lt.s32.totalorder %s620_s15, 3 }
   0x4   : > { %p173_p2 = pnand %p593_p0, %p172_p1 }
   0x5   : > { %v260_v0 = vld [vmem:[%s772_s1 + $0x10] sm:$0xff] (!%p173_p2)  ;;  %v258_v1 = vld [vmem:[%s772_s1] sm:$0xff] (!%p173_p2)  ;;  %v622_v2 = vmov (!%p173_p2), 0   ;;  %v261_v3 = vld [vmem:[%s772_s1 + $0x18] sm:$0xff] (!%p173_p2)  ;;  %p203_p3 = scmp.lt.s32.totalorder (!%p173_p2), %s589_s16, 1 }
   0x6   : > { %176 = sbr.rel (%p173_p2) target bundleno = 184 (0xb8), region = 36  ;;  %613 = vset.pattern.permute.xlu1 (!%p173_p2), %v622_v2  ;;  %612 = vset.pattern.permute.xlu0 (!%p173_p2), %v622_v2  ;;  %v259_v4 = vld [vmem:[%s772_s1 + $0x8] sm:$0xff] (!%p173_p2)  ;;  %v262_v6 = vld [vmem:[%s772_s1 + $0x20] sm:$0xff] (!%p173_p2)  ;;  %v265_v7 = vld [vmem:[%s772_s1 + $0x38] sm:$0xff] (!%p173_p2) }
   0x7   : > { %278 = vperm.xlu1 (!%p173_p2), %613, %v260_v0   ;;  %268 = vperm.xlu0 (!%p173_p2), %612, %v258_v1   ;;  %v263_v5 = vld [vmem:[%s772_s1 + $0x28] sm:$0xff] (!%p173_p2)  ;;  %v264_v8 = vld [vmem:[%s772_s1 + $0x30] sm:$0xff] (!%p173_p2)  ;;  %v330_v10 = vld [vmem:[%s773_s2] sm:$0xff] (!%p173_p2) }
   0x8   : > { %v331_v9 = vld [vmem:[%s773_s2 + $0x8] sm:$0xff] (!%p173_p2)  ;;  %v333_v11 = vld [vmem:[%s773_s2 + $0x18] sm:$0xff] (!%p173_p2)  ;;  %v332_v12 = vld [vmem:[%s773_s2 + $0x10] sm:$0xff] (!%p173_p2) }
   0x9   : > { %v335_v13 = vld [vmem:[%s773_s2 + $0x28] sm:$0xff] (!%p173_p2)  ;;  %v334_v14 = vld [vmem:[%s773_s2 + $0x20] sm:$0xff] (!%p173_p2)  ;;  %v337_v15 = vld [vmem:[%s773_s2 + $0x38] sm:$0xff] (!%p173_p2) }
   0xa   : > { %v336_v16 = vld [vmem:[%s773_s2 + $0x30] sm:$0xff] (!%p173_p2) }
   0xb   : > { %283 = vperm.xlu1 (!%p173_p2), %613, %v261_v3   ;;  %273 = vperm.xlu0 (!%p173_p2), %612, %v259_v4  }
   0xd   : > { %s777_s16 = smov (!%p203_p3, %s589_s16), 1 }
   0xe   : > { %s600_s21 = sshll.u32 %s777_s16, 6  ;;  %s601_s29 = smul.u32 96, %s777_s16 }
   0xf   : > { %293 = vperm.xlu1 %613, %v263_v5   ;;  %288 = vperm.xlu0 %612, %v262_v6   ;;  %s212_s28 = scalar_lea.vmem %s774_s3, %s600_s21  ;;  %s602_s7 = smul.u32 192, %s777_s16 }
  0x10   : > { %v427_v17 = vld [vmem:[%s212_s28 + $0x8] sm:$0xff]  ;;  %v426_v18 = vld [vmem:[%s212_s28] sm:$0xff]  ;;  %v429_v19 = vld [vmem:[%s212_s28 + $0x18] sm:$0xff]  ;;  %s207_s6 = scalar_lea.vmem %s771_s0, %s601_s29 }
  0x11   : > { %v428_v20 = vld [vmem:[%s212_s28 + $0x10] sm:$0xff]  ;;  %v431_v21 = vld [vmem:[%s212_s28 + $0x28] sm:$0xff]  ;;  %v430_v22 = vld [vmem:[%s212_s28 + $0x20] sm:$0xff]  ;;  %s739_s9 = scalar_lea.vmem %s775_s4, %s602_s7 }
  0x12   : > { %v433_v23 = vld [vmem:[%s212_s28 + $0x38] sm:$0xff]  ;;  %v432_v24 = vld [vmem:[%s212_s28 + $0x30] sm:$0xff]  ;;  %v223_v34 = vld [vmem:[%s207_s6 + $0x8] ss:$24 sps:$4 sm:$0xff]  }
  0x13   : > { %303 = vperm.xlu1 %613, %v265_v7   ;;  %298 = vperm.xlu0 %612, %v264_v8   ;;  %v222_v31 = vld [vmem:[%s207_s6 + $0x18] sm:$0xff]  ;;  %v218_v35 = vld [vmem:[%s207_s6] sm:$0xff]  ;;  %v225_v37 = vld [vmem:[%s207_s6 + $0x14] ss:$24 sps:$4 sm:$0xff]   ;;  %v242_v42 = vunpack.c.h.bf16 %v223_v34  ;;  %v236_v45 = vunpack.c.l.bf16 %v223_v34 }
  0x14   : > { %v224_v36 = vld [vmem:[%s207_s6 + $0x24] sm:$0xff]  ;;  %v220_v38 = vld [vmem:[%s207_s6 + $0xc] sm:$0xff]  ;;  %v240_v39 = vunpack.c.l.bf16 %v222_v31  ;;  %v241_v40 = vunpack.c.h.bf16 %v222_v31  ;;  %v228_v41 = vld [vmem:[%s207_s6 + $0x3c] sm:$0xff]  ;;  %v234_v43 = vunpack.c.l.bf16 %v218_v35  ;;  %v235_v44 = vunpack.c.h.bf16 %v218_v35 }
  0x15   : > { %v229_v46 = vld [vmem:[%s207_s6 + $0x38] ss:$12 sps:$4 sm:$0xff]   ;;  %v226_v47 = vld [vmem:[%s207_s6 + $0x30] sm:$0xff]  ;;  %v243_v50 = vunpack.c.l.bf16 %v224_v36  ;;  %v244_v51 = vunpack.c.h.bf16 %v224_v36  ;;  %v245_v52 = vunpack.c.h.bf16 %v225_v37  ;;  %v237_v53 = vunpack.c.l.bf16 %v220_v38  ;;  %v230_v56 = vld [vmem:[%s207_s6 + $0x48] sm:$0xff] }
  0x16   : > { %v232_v54 = vld [vmem:[%s207_s6 + $0x54] sm:$0xff]  ;;  %v233_v55 = vld [vmem:[%s207_s6 + $0x50] ss:$12 sps:$4 sm:$0xff]   ;;  %v238_v57 = vunpack.c.h.bf16 %v220_v38  ;;  %v239_v58 = vunpack.c.l.bf16 %v225_v37  ;;  %v249_v59 = vunpack.c.l.bf16 %v228_v41  ;;  %v250_v60 = vunpack.c.h.bf16 %v228_v41 }
  0x17   : > { %345 = vperm.xlu1 %613, %v331_v9   ;;  %340 = vperm.xlu0 %612, %v330_v10   ;;  %v251_v61 = vunpack.c.h.bf16 %v229_v46  ;;  %v246_v62 = vunpack.c.l.bf16 %v226_v47  ;;  %v247_v63 = vunpack.c.h.bf16 %v226_v47  ;;  %v248_v0 = vunpack.c.l.bf16 %v229_v46 }
  0x18   : > { %v255_v1 = vunpack.c.l.bf16 %v232_v54  ;;  %v256_v2 = vunpack.c.h.bf16 %v232_v54  ;;  %v257_v3 = vunpack.c.h.bf16 %v233_v55  ;;  %v252_v4 = vunpack.c.l.bf16 %v230_v56 }
  0x19   : > { %v253_v9 = vunpack.c.h.bf16 %v230_v56  ;;  %v254_v10 = vunpack.c.l.bf16 %v233_v55 }
  0x1b   : > { %355 = vperm.xlu1 %613, %v333_v11   ;;  %350 = vperm.xlu0 %612, %v332_v12  }
  0x1f   : > { %365 = vperm.xlu1 %613, %v335_v13   ;;  %360 = vperm.xlu0 %612, %v334_v14  }
  0x23   : > { %375 = vperm.xlu1 %613, %v337_v15   ;;  %370 = vperm.xlu0 %612, %v336_v16  }
  0x27   : > { %441 = vperm.xlu1 %613, %v427_v17   ;;  %436 = vperm.xlu0 %612, %v426_v18  }
  0x2b   : > { %451 = vperm.xlu1 %613, %v429_v19   ;;  %446 = vperm.xlu0 %612, %v428_v20  }
  0x2f   : > { %461 = vperm.xlu1 %613, %v431_v21   ;;  %456 = vperm.xlu0 %612, %v430_v22  }
  0x33   : > { %471 = vperm.xlu1 %613, %v433_v23   ;;  %466 = vperm.xlu0 %612, %v432_v24  }
  0x86   : > { %v279_v25 = vpop.permute.xlu1 %278  ;;  %v269_v26 = vpop.permute.xlu0 %268 }
  0x87   : > { %v312_v7 = vmul.f32 %v279_v25, %v240_v39  ;;  %v313_v8 = vmul.f32 %v279_v25, %v241_v40  ;;  %v314_v11 = vmul.f32 %v279_v25, %v242_v42  ;;  %v306_v12 = vmul.f32 %v269_v26, %v234_v43 }
  0x88   : > { %v307_v13 = vmul.f32 %v269_v26, %v235_v44  ;;  %v308_v14 = vmul.f32 %v269_v26, %v236_v45 }
  0x8a   : > { %v284_v27 = vpop.permute.xlu1 %283  ;;  %v274_v28 = vpop.permute.xlu0 %273 }
  0x8b   : > { %v315_v15 = vmul.f32 %v284_v27, %v243_v50  ;;  %v316_v16 = vmul.f32 %v284_v27, %v244_v51  ;;  %v309_v17 = vmul.f32 %v274_v28, %v237_v53  ;;  %v310_v18 = vmul.f32 %v274_v28, %v238_v57 }
  0x8c   : > { %v317_v19 = vmul.f32 %v284_v27, %v245_v52  ;;  %v311_v20 = vmul.f32 %v274_v28, %v239_v58 }
  0x8e   : > { %v294_v29 = vpop.permute.xlu1 %293  ;;  %v715_v30 = vpop.permute.xlu0 %288 }
  0x8f   : > { %v321_v21 = vmul.f32 %v294_v29, %v249_v59  ;;  %v322_v22 = vmul.f32 %v294_v29, %v250_v60  ;;  %v323_v31 = vmul.f32 %v294_v29, %v251_v61  ;;  %v318_v34 = vmul.f32 %v715_v30, %v246_v62 }
  0x90   : > { %v319_v39 = vmul.f32 %v715_v30, %v247_v63  ;;  %v320_v40 = vmul.f32 %v715_v30, %v248_v0 }
  0x92   : > { %v720_v32 = vpop.permute.xlu1 %303  ;;  %v722_v33 = vpop.permute.xlu0 %298 }
  0x93   : > { %v327_v27 = vmul.f32 %v720_v32, %v255_v1  ;;  %v328_v28 = vmul.f32 %v720_v32, %v256_v2  ;;  %v329_v41 = vmul.f32 %v720_v32, %v257_v3  ;;  %v324_v29 = vmul.f32 %v722_v33, %v252_v4 }
  0x94   : > { %v325_v46 = vmul.f32 %v722_v33, %v253_v9  ;;  %v326_v47 = vmul.f32 %v722_v33, %v254_v10 }
  0x96   : > { %v346_v48 = vpop.permute.xlu1 %345  ;;  %v341_v49 = vpop.permute.xlu0 %340 }
  0x97   : > { %v381_v35 = vadd.f32 %v346_v48, %v309_v17  ;;  %v382_v36 = vadd.f32 %v346_v48, %v310_v18  ;;  %v383_v25 = vadd.f32 %v346_v48, %v311_v20  ;;  %v378_v37 = vadd.f32 %v341_v49, %v306_v12 }
  0x98   : > { %v379_v38 = vadd.f32 %v341_v49, %v307_v13  ;;  %v380_v26 = vadd.f32 %v341_v49, %v308_v14 }
  0x99   : > { %v405_v48 = vmax.f32 %v381_v35, 0.0  ;;  %v406_v30 = vmax.f32 %v382_v36, 0.0  ;;  %v407_v49 = vmax.f32 %v383_v25, 0.0  ;;  %v402_v50 = vmax.f32 %v378_v37, 0.0 }
  0x9a   : > { %v356_v5 = vpop.permute.xlu1 %355  ;;  %v351_v6 = vpop.permute.xlu0 %350  ;;  %v403_v51 = vmax.f32 %v379_v38, 0.0  ;;  %v404_v52 = vmax.f32 %v380_v26, 0.0 }
  0x9b   : > { %v387_v42 = vadd.f32 %v356_v5, %v315_v15  ;;  %v388_v43 = vadd.f32 %v356_v5, %v316_v16  ;;  %v389_v53 = vadd.f32 %v356_v5, %v317_v19  ;;  %v384_v54 = vadd.f32 %v351_v6, %v312_v7 }
  0x9c   : > { %v385_v32 = vadd.f32 %v351_v6, %v313_v8  ;;  %v386_v55 = vadd.f32 %v351_v6, %v314_v11 }
  0x9d   : > { %v411_v56 = vmax.f32 %v387_v42, 0.0  ;;  %v412_v57 = vmax.f32 %v388_v43, 0.0  ;;  %v413_v5 = vmax.f32 %v389_v53, 0.0  ;;  %v408_v6 = vmax.f32 %v384_v54, 0.0 }
  0x9e   : > { %v366_v23 = vpop.permute.xlu1 %365  ;;  %v361_v24 = vpop.permute.xlu0 %360  ;;  %v409_v7 = vmax.f32 %v385_v32, 0.0  ;;  %v410_v8 = vmax.f32 %v386_v55, 0.0 }
  0x9f   : > { %v393_v58 = vadd.f32 %v366_v23, %v321_v21  ;;  %v394_v33 = vadd.f32 %v366_v23, %v322_v22  ;;  %v395_v1 = vadd.f32 %v366_v23, %v323_v31  ;;  %v390_v2 = vadd.f32 %v361_v24, %v318_v34 }
  0xa0   : > { %v391_v11 = vadd.f32 %v361_v24, %v319_v39  ;;  %v392_v12 = vadd.f32 %v361_v24, %v320_v40 }
  0xa1   : > { %v417_v9 = vmax.f32 %v393_v58, 0.0  ;;  %v418_v10 = vmax.f32 %v394_v33, 0.0  ;;  %v419_v19 = vmax.f32 %v395_v1, 0.0  ;;  %v414_v20 = vmax.f32 %v390_v2, 0.0 }
  0xa2   : > { %v376_v44 = vpop.permute.xlu1 %375  ;;  %v732_v45 = vpop.permute.xlu0 %370  ;;  %v415_v35 = vmax.f32 %v391_v11, 0.0  ;;  %v416_v36 = vmax.f32 %v392_v12, 0.0 }
  0xa3   : > { %v399_v23 = vadd.f32 %v376_v44, %v327_v27  ;;  %v400_v24 = vadd.f32 %v376_v44, %v328_v28  ;;  %v401_v31 = vadd.f32 %v376_v44, %v329_v41  ;;  %v396_v34 = vadd.f32 %v732_v45, %v324_v29 }
  0xa4   : > { %v397_v25 = vadd.f32 %v732_v45, %v325_v46  ;;  %v398_v37 = vadd.f32 %v732_v45, %v326_v47 }
  0xa5   : > { %v423_v42 = vmax.f32 %v399_v23, 0.0  ;;  %v424_v43 = vmax.f32 %v400_v24, 0.0  ;;  %v425_v44 = vmax.f32 %v401_v31, 0.0  ;;  %v420_v45 = vmax.f32 %v396_v34, 0.0 }
  0xa6   : > { %v442_v59 = vpop.permute.xlu1 %441  ;;  %v437_v60 = vpop.permute.xlu0 %436 }
  0xa7   : > { %v477_v61 = vmul.f32 %v442_v59, %v405_v48  ;;  %v478_v62 = vmul.f32 %v442_v59, %v406_v30  ;;  %v479_v63 = vmul.f32 %v442_v59, %v407_v49  ;;  %v474_v0 = vmul.f32 %v437_v60, %v402_v50 }
  0xa8   : > { %v475_v3 = vmul.f32 %v437_v60, %v403_v51  ;;  %v476_v4 = vmul.f32 %v437_v60, %v404_v52  ;;  %v421_v48 = vmax.f32 %v397_v25, 0.0  ;;  %v422_v30 = vmax.f32 %v398_v37, 0.0 }
  0xa9   : > { %501 = vst [vmem:[%s739_s9 + $0x18] sm:$0xff] %v477_v61  ;;  %502 = vst [vmem:[%s739_s9 + $0x20] sm:$0xff] %v478_v62 }
  0xaa   : > { %503 = vst [vmem:[%s739_s9 + $0x28] sm:$0xff] %v479_v63  ;;  %498 = vst [vmem:[%s739_s9] sm:$0xff] %v474_v0  ;;  %v452_v13 = vpop.permute.xlu1 %451  ;;  %v447_v14 = vpop.permute.xlu0 %446 }
  0xab   : > { %499 = vst [vmem:[%s739_s9 + $0x8] sm:$0xff] %v475_v3  ;;  %500 = vst [vmem:[%s739_s9 + $0x10] sm:$0xff] %v476_v4  ;;  %v483_v15 = vmul.f32 %v452_v13, %v411_v56  ;;  %v484_v16 = vmul.f32 %v452_v13, %v412_v57  ;;  %v485_v17 = vmul.f32 %v452_v13, %v413_v5 }
  0xac   : > { %v480_v18 = vmul.f32 %v447_v14, %v408_v6  ;;  %v481_v21 = vmul.f32 %v447_v14, %v409_v7  ;;  %v482_v22 = vmul.f32 %v447_v14, %v410_v8 }
  0xad   : > { %507 = vst [vmem:[%s739_s9 + $0x48] sm:$0xff] %v483_v15  ;;  %508 = vst [vmem:[%s739_s9 + $0x50] sm:$0xff] %v484_v16 }
  0xae   : > { %509 = vst [vmem:[%s739_s9 + $0x58] sm:$0xff] %v485_v17  ;;  %504 = vst [vmem:[%s739_s9 + $0x30] sm:$0xff] %v480_v18  ;;  %v462_v38 = vpop.permute.xlu1 %461  ;;  %v457_v26 = vpop.permute.xlu0 %456 }
  0xaf   : > { %505 = vst [vmem:[%s739_s9 + $0x38] sm:$0xff] %v481_v21  ;;  %506 = vst [vmem:[%s739_s9 + $0x40] sm:$0xff] %v482_v22  ;;  %v489_v39 = vmul.f32 %v462_v38, %v417_v9  ;;  %v490_v40 = vmul.f32 %v462_v38, %v418_v10  ;;  %v491_v27 = vmul.f32 %v462_v38, %v419_v19 }
  0xb0   : > { %v486_v28 = vmul.f32 %v457_v26, %v414_v20  ;;  %v487_v41 = vmul.f32 %v457_v26, %v415_v35  ;;  %v488_v29 = vmul.f32 %v457_v26, %v416_v36 }
  0xb1   : > { %513 = vst [vmem:[%s739_s9 + $0x78] sm:$0xff] %v489_v39  ;;  %514 = vst [vmem:[%s739_s9 + $0x80] sm:$0xff] %v490_v40 }
  0xb2   : > { %515 = vst [vmem:[%s739_s9 + $0x88] sm:$0xff] %v491_v27  ;;  %510 = vst [vmem:[%s739_s9 + $0x60] sm:$0xff] %v486_v28  ;;  %v472_v46 = vpop.permute.xlu1 %471  ;;  %v467_v47 = vpop.permute.xlu0 %466 }
  0xb3   : > { %511 = vst [vmem:[%s739_s9 + $0x68] sm:$0xff] %v487_v41  ;;  %512 = vst [vmem:[%s739_s9 + $0x70] sm:$0xff] %v488_v29  ;;  %v495_v49 = vmul.f32 %v472_v46, %v423_v42  ;;  %v496_v50 = vmul.f32 %v472_v46, %v424_v43  ;;  %v497_v51 = vmul.f32 %v472_v46, %v425_v44 }
  0xb4   : > { %v492_v52 = vmul.f32 %v467_v47, %v420_v45  ;;  %v493_v53 = vmul.f32 %v467_v47, %v421_v48  ;;  %v494_v54 = vmul.f32 %v467_v47, %v422_v30 }
  0xb5   : > { %519 = vst [vmem:[%s739_s9 + $0xa8] sm:$0xff] %v495_v49  ;;  %520 = vst [vmem:[%s739_s9 + $0xb0] sm:$0xff] %v496_v50 }
  0xb6   : > { %521 = vst [vmem:[%s739_s9 + $0xb8] sm:$0xff] %v497_v51  ;;  %516 = vst [vmem:[%s739_s9 + $0x90] sm:$0xff] %v492_v52 }
  0xb7   : > { %517 = vst [vmem:[%s739_s9 + $0x98] sm:$0xff] %v493_v53  ;;  %518 = vst [vmem:[%s739_s9 + $0xa0] sm:$0xff] %v494_v54 }
  0xb8 PF: > { %s14_s15 = sadd.s32 1, %s620_s15  }
  0xb9   : > { %p11_p4 = scmp.ge.s32.totalorder %s14_s15, 4  }
  0xbb   :  { %13 = sbr.rel (!%p11_p4) target bundleno = 1 (0x1), region = 69 }

// kernel: arm_forward.3
= control target key start
LH: loop header
LB: loop body
LE: loop exit
PB: predicated region body
PF: predicated region fallthrough
CT: control target
= control target key end

     0   :  { %s3371_s18 = smov 0   ;;  %s4130_s0 = inlined_call_operand.vmem [shape: bf16[2,32,512], index: 0, kind: input, shape index: {}]   ;;  %s4131_s1 = inlined_call_operand.vmem [shape: bf16[9,64,32], index: 1, kind: input, shape index: {}]   ;;  %s4132_s2 = inlined_call_operand.vmem [shape: f32[1,384], index: 2, kind: input, shape index: {}]   ;;  %s4133_s3 = inlined_call_operand.vmem [shape: bf16[2,64,384], index: 3, kind: output, shape index: {0}]   ;;  %s4134_s4 = inlined_call_operand.vmem [shape: f32[2,64,1], index: 4, kind: output, shape index: {1}]   ;;  %s4135_s5 = inlined_call_operand.vmem [shape: f32[2,64,1], index: 5, kind: output, shape index: {2}]  }
   0x1 LB: > { %s2671_s19 = sadd.s32 4294967295, %s3330_s18   ;;  %p2675_p0 = scmp.ge.s32.totalorder %s3330_s18, 1  ;;  %s3330_s18 = sphi %s3371_s18, %s16_s18  }
   0x2   : > { %p192_p1 = scmp.lt.s32.totalorder %s3330_s18, 3 }
   0x4   : > { %p193_p2 = pnand %p2675_p0, %p192_p1 }
   0x5   : > { %p230_p3 = scmp.lt.s32.totalorder (!%p193_p2), %s2671_s19, 1  ;;  %s3332_s24 = smov (!%p193_p2), 126   ;;  %v3334_v4 = vmov (!%p193_p2), 0   ;;  %vm729_vm0 = vcmask (!%p193_p2), 1031168   ;;  %vm344_vm1 = vcmask (!%p193_p2), 1039360   ;;  %v3522_v25 = vld [vmem:[%s4131_s1 + $0x40] sm:$0xff] (!%p193_p2)  }
   0x6   : > { %196 = sbr.rel (%p193_p2) target bundleno = 749 (0x2ed), region = 32  ;;  %s3333_s25 = smov (!%p193_p2), 127   ;;  %786 = vmatprep.mubr.bf16.mxu0 (!%p193_p2), %v3334_v4  ;;  %402 = vmatprep.mubr.bf16.mxu1 (!%p193_p2), %v3334_v4  ;;  %vm357_vm2 = vcmask (!%p193_p2), 261120   ;;  %v3289_v30 = vld [vmem:[%s4131_s1 + $0x20] sm:$0xff] (!%p193_p2)   ;;  %vm961_vm3 = vcmask (!%p193_p2), 900096   ;;  %v3538_v33 = vld [vmem:[%s4131_s1 + $0x48] sm:$0xff] (!%p193_p2)  }
   0x7   : > { %s3335_s26 = smov (!%p193_p2), 110   ;;  %s3336_s27 = smov (!%p193_p2), 109   ;;  %v3291_v38 = vld [vmem:[%s4131_s1 + $0x28] sm:$0xff] (!%p193_p2)   ;;  %v3558_v42 = vld [vmem:[%s4131_s1 + $0x50] sm:$0xff] (!%p193_p2)   ;;  %vm1193_vm4 = vcmask (!%p193_p2), 891904   ;;  %v3576_v51 = vld [vmem:[%s4131_s1 + $0x60] sm:$0xff] (!%p193_p2)  }
   0x8   : > { %s3337_s28 = smov (!%p193_p2), 108   ;;  %s3338_s29 = smov (!%p193_p2), 92   ;;  %v3293_v47 = vld [vmem:[%s4131_s1 + $0x30] sm:$0xff] (!%p193_p2)   ;;  %v3295_v56 = vld [vmem:[%s4131_s1 + $0x38] sm:$0xff] (!%p193_p2)   ;;  %v3595_v59 = vld [vmem:[%s4131_s1 + $0x68] sm:$0xff] (!%p193_p2)   ;;  %vm1425_vm5 = vcmask (!%p193_p2), 883712  }
   0x9   : > { %s3339_s30 = smov (!%p193_p2), 91   ;;  %s3340_s6 = smov (!%p193_p2), 90   ;;  %vm1657_vm6 = vcmask (!%p193_p2), 752640   ;;  %vm1889_vm7 = vcmask (!%p193_p2), 744448   ;;  %vm2121_vm8 = vcmask (!%p193_p2), 736256   ;;  %vm2477_vm9 = vcmask (!%p193_p2), 7168  }
   0xd   : > { %s4137_s19 = smov (!%p230_p3, %s2671_s19), 1 }
   0xe   : > { %s3382_s20 = sshll.u32 %s4137_s19, 6  ;;  %s3258_s15 = smul.u32 96, %s4137_s19 }
   0xf   : > { %s3388_s23 = scalar_lea.vmem %s4130_s0, %s3382_s20 }
  0x10   : > { %v3391_v0 = vld [vmem:[%s3388_s23 + $0x4] ss:$16 sps:$4 sm:$0xff]   ;;  %v3394_v1 = vld [vmem:[%s3388_s23] ss:$16 sps:$4 sm:$0xff]   ;;  %v3399_v2 = vld [vmem:[%s3388_s23 + $0x8] ss:$16 sps:$4 sm:$0xff]   ;;  %s3994_s21 = scalar_lea.vmem %s4133_s3, %s3258_s15 }
  0x11   : > { %715 = vrot.lane.b32.xlu0 %v3391_v0, %s3332_s24  ;;  %713 = vrot.lane.b32.xlu1 %v3394_v1, %s3332_s24  ;;  %v3404_v3 = vld [vmem:[%s3388_s23 + $0x24] ss:$16 sps:$4 sm:$0xff]   ;;  %v3412_v5 = vld [vmem:[%s3388_s23 + $0x28] ss:$16 sps:$4 sm:$0xff]  }
  0x12   : > { %v3420_v6 = vld [vmem:[%s3388_s23 + $0x20] ss:$16 sps:$4 sm:$0xff]   ;;  %v3439_v7 = vld [vmem:[%s3388_s23 + $0xc] ss:$16 sps:$4 sm:$0xff]  }
  0x13   : > { %v3444_v8 = vld [vmem:[%s3388_s23 + $0x2c] ss:$16 sps:$4 sm:$0xff]   ;;  %s4087_s23 = scalar_lea.vmem %s4134_s4, %s3382_s20 }
  0x15   : > { %717 = vrot.lane.b32.xlu0 %v3399_v2, %s3332_s24  ;;  %330 = vrot.lane.b32.xlu1 %v3391_v0, %s3333_s25 }
  0x19   : > { %332 = vrot.lane.b32.xlu0 %v3399_v2, %s3333_s25  ;;  %723 = vrot.lane.b32.xlu1 %v3404_v3, %s3332_s24 }
  0x1d   : > { %725 = vrot.lane.b32.xlu0 %v3412_v5, %s3332_s24  ;;  %328 = vrot.lane.b32.xlu1 %v3394_v1, %s3333_s25 }
  0x21   : > { %721 = vrot.lane.b32.xlu0 %v3420_v6, %s3332_s24  ;;  %338 = vrot.lane.b32.xlu1 %v3404_v3, %s3333_s25 }
  0x25   : > { %340 = vrot.lane.b32.xlu0 %v3412_v5, %s3333_s25  ;;  %336 = vrot.lane.b32.xlu1 %v3420_v6, %s3333_s25 }
  0x29   : > { %947 = vrot.lane.b32.xlu0 %v3391_v0, %s3335_s26  ;;  %949 = vrot.lane.b32.xlu1 %v3399_v2, %s3335_s26 }
  0x2d   : > { %945 = vrot.lane.b32.xlu0 %v3394_v1, %s3335_s26  ;;  %955 = vrot.lane.b32.xlu1 %v3404_v3, %s3335_s26 }
  0x31   : > { %957 = vrot.lane.b32.xlu0 %v3412_v5, %s3335_s26  ;;  %953 = vrot.lane.b32.xlu1 %v3420_v6, %s3335_s26 }
  0x35   : > { %334 = vrot.lane.b32.xlu0 %v3439_v7, %s3333_s25  ;;  %342 = vrot.lane.b32.xlu1 %v3444_v8, %s3333_s25 }
  0x39   : > { %1179 = vrot.lane.b32.xlu0 %v3391_v0, %s3336_s27  ;;  %1181 = vrot.lane.b32.xlu1 %v3399_v2, %s3336_s27 }
  0x3d   : > { %1177 = vrot.lane.b32.xlu0 %v3394_v1, %s3336_s27  ;;  %1187 = vrot.lane.b32.xlu1 %v3404_v3, %s3336_s27 }
  0x41   : > { %1189 = vrot.lane.b32.xlu0 %v3412_v5, %s3336_s27  ;;  %1185 = vrot.lane.b32.xlu1 %v3420_v6, %s3336_s27 }
  0x45   : > { %1411 = vrot.lane.b32.xlu0 %v3391_v0, %s3337_s28  ;;  %1413 = vrot.lane.b32.xlu1 %v3399_v2, %s3337_s28 }
  0x49   : > { %1409 = vrot.lane.b32.xlu0 %v3394_v1, %s3337_s28  ;;  %1419 = vrot.lane.b32.xlu1 %v3404_v3, %s3337_s28 }
  0x4d   : > { %1421 = vrot.lane.b32.xlu0 %v3412_v5, %s3337_s28  ;;  %1417 = vrot.lane.b32.xlu1 %v3420_v6, %s3337_s28 }
  0x51   : > { %719 = vrot.lane.b32.xlu0 %v3439_v7, %s3332_s24  ;;  %727 = vrot.lane.b32.xlu1 %v3444_v8, %s3332_s24 }
  0x55   : > { %1643 = vrot.lane.b32.xlu0 %v3391_v0, %s3338_s29  ;;  %1645 = vrot.lane.b32.xlu1 %v3399_v2, %s3338_s29 }
  0x59   : > { %1641 = vrot.lane.b32.xlu0 %v3394_v1, %s3338_s29  ;;  %951 = vrot.lane.b32.xlu1 %v3439_v7, %s3335_s26 }
  0x5d   : > { %1651 = vrot.lane.b32.xlu0 %v3404_v3, %s3338_s29  ;;  %1653 = vrot.lane.b32.xlu1 %v3412_v5, %s3338_s29 }
  0x61   : > { %1649 = vrot.lane.b32.xlu0 %v3420_v6, %s3338_s29  ;;  %959 = vrot.lane.b32.xlu1 %v3444_v8, %s3335_s26  ;;  %s4093_s26 = scalar_lea.vmem %s4135_s5, %s3382_s20 }
  0x65   : > { %1183 = vrot.lane.b32.xlu0 %v3439_v7, %s3336_s27  ;;  %1191 = vrot.lane.b32.xlu1 %v3444_v8, %s3336_s27 }
  0x69   : > { %1875 = vrot.lane.b32.xlu0 %v3391_v0, %s3339_s30  ;;  %1877 = vrot.lane.b32.xlu1 %v3399_v2, %s3339_s30 }
  0x6d   : > { %1873 = vrot.lane.b32.xlu0 %v3394_v1, %s3339_s30  ;;  %1415 = vrot.lane.b32.xlu1 %v3439_v7, %s3337_s28 }
  0x71   : > { %1883 = vrot.lane.b32.xlu0 %v3404_v3, %s3339_s30  ;;  %1885 = vrot.lane.b32.xlu1 %v3412_v5, %s3339_s30 }
  0x75   : > { %1881 = vrot.lane.b32.xlu0 %v3420_v6, %s3339_s30  ;;  %1423 = vrot.lane.b32.xlu1 %v3444_v8, %s3337_s28 }
  0x79   : > { %1647 = vrot.lane.b32.xlu0 %v3439_v7, %s3338_s29  ;;  %1655 = vrot.lane.b32.xlu1 %v3444_v8, %s3338_s29 }
  0x7d   : > { %2107 = vrot.lane.b32.xlu0 %v3391_v0, %s3340_s6  ;;  %2109 = vrot.lane.b32.xlu1 %v3399_v2, %s3340_s6 }
  0x81   : > { %2105 = vrot.lane.b32.xlu0 %v3394_v1, %s3340_s6  ;;  %1879 = vrot.lane.b32.xlu1 %v3439_v7, %s3339_s30 }
  0x83   : > { %v716_v9 = vpop.permute.xlu0 %715  ;;  %v714_v10 = vpop.permute.xlu1 %713 }
  0x84   : > { %v3500_v14 = vsel %vm729_vm0, %v714_v10, %v716_v9 }
  0x85   : > { %2115 = vrot.lane.b32.xlu0 %v3404_v3, %s3340_s6  ;;  %2117 = vrot.lane.b32.xlu1 %v3412_v5, %s3340_s6 }
  0x87   : > { %v3492_v11 = vpop.permute.xlu0 %717  ;;  %v331_v12 = vpop.permute.xlu1 %330 }
  0x88   : > { %v3496_v13 = vsel %vm729_vm0, %v716_v9, %v3492_v11  ;;  %v3612_v9 = vld [vmem:[%s4131_s1 + $0x70] sm:$0xff]  }
  0x89   : > { %754 = vmatprep.subr.bf16.mxu0 %v3496_v13  ;;  %2113 = vrot.lane.b32.xlu0 %v3420_v6, %s3340_s6 }
  0x8a   : > { %755 = vmatpush1.bf16.msra.mxu0 %v3500_v14  ;;  %1887 = vrot.lane.b32.xlu1 %v3444_v8, %s3339_s30 }
  0x8b   : > { %v333_v15 = vpop.permute.xlu0 %332  ;;  %v724_v16 = vpop.permute.xlu1 %723 }
  0x8c   : > { %v346_v17 = vsel %vm344_vm1, %v331_v12, %v333_v15 }
  0x8d   : > { %370 = vmatprep.subr.bf16.mxu1 %v346_v17  ;;  %2111 = vrot.lane.b32.xlu0 %v3439_v7, %s3340_s6 }
  0x8e   : > { %2119 = vrot.lane.b32.xlu1 %v3444_v8, %s3340_s6 }
  0x8f   : > { %v3508_v18 = vpop.permute.xlu0 %725  ;;  %v329_v19 = vpop.permute.xlu1 %328 }
  0x90   : > { %v3512_v20 = vsel %vm729_vm0, %v724_v16, %v3508_v18  ;;  %v345_v21 = vsel %vm344_vm1, %v329_v19, %v331_v12 }
  0x91   : > { %756 = vmatprep.subr.bf16.mxu0 %v3512_v20  ;;  %371 = vmatpush1.bf16.msra.mxu1 %v345_v21 }
  0x93   : > { %v722_v22 = vpop.permute.xlu0 %721  ;;  %v339_v23 = vpop.permute.xlu1 %338 }
  0x94   : > { %v3517_v24 = vsel %vm729_vm0, %v722_v22, %v724_v16 }
  0x95   : > { %757 = vmatpush1.bf16.msra.mxu0 %v3517_v24 }
  0x97   : > { %v341_v26 = vpop.permute.xlu0 %340  ;;  %v337_v27 = vpop.permute.xlu1 %336 }
  0x98   : > { %2735 = vmatmul.mubr.msk.bf16.vlgmr.msra.gmra.mrb[0].mxu0 %vm357_vm2, %v3522_v25  ;;  %v349_v28 = vsel %vm344_vm1, %v339_v23, %v341_v26  ;;  %v348_v29 = vsel %vm344_vm1, %v337_v27, %v339_v23 }
  0x99   : > { %372 = vmatprep.subr.bf16.mxu1 %v349_v28  ;;  %796 = vmatprep.mubr.bf16.mxu0 %v3334_v4 }
  0x9a   : > { %373 = vmatpush1.bf16.msra.mxu1 %v348_v29 }
  0x9b   : > { %v948_v31 = vpop.permute.xlu0 %947  ;;  %v3533_v32 = vpop.permute.xlu1 %949 }
  0x9c   : > { %v963_v34 = vsel %vm961_vm3, %v948_v31, %v3533_v32 }
  0x9d   : > { %2703 = vmatmul.mubr.msk.bf16.vlgmr.msra.gmra.mrb[0].mxu1 %vm357_vm2, %v3289_v30  ;;  %986 = vmatprep.subr.bf16.mxu0 %v963_v34 }
  0x9e   : > { %412 = vmatprep.mubr.bf16.mxu1 %v3334_v4 }
  0x9f   : > { %v946_v35 = vpop.permute.xlu0 %945  ;;  %v956_v37 = vpop.permute.xlu1 %955 }
  0xa0   : > { %v962_v36 = vsel %vm961_vm3, %v946_v35, %v948_v31  ;;  %2736 = vmatmul.mubr.msk.bf16.gmra.mrb[4].mxu0 %vm357_vm2, %v3538_v33  ;;  %v3685_v35 = vld [vmem:[%s4131_s1 + $0x88] sm:$0xff]  }
  0xa1   : > { %987 = vmatpush1.bf16.msra.mxu0 %v962_v36  ;;  %806 = vmatprep.mubr.bf16.mxu0 %v3334_v4 }
  0xa3   : > { %v3551_v39 = vpop.permute.xlu0 %957  ;;  %v954_v40 = vpop.permute.xlu1 %953 }
  0xa4   : > { %v966_v41 = vsel %vm961_vm3, %v956_v37, %v3551_v39  ;;  %v965_v43 = vsel %vm961_vm3, %v954_v40, %v956_v37 }
  0xa5   : > { %2704 = vmatmul.mubr.msk.bf16.gmra.mrb[4].mxu1 %vm357_vm2, %v3291_v38  ;;  %988 = vmatprep.subr.bf16.mxu0 %v966_v41 }
  0xa6   : > { %422 = vmatprep.mubr.bf16.mxu1 %v3334_v4  ;;  %989 = vmatpush1.bf16.msra.mxu0 %v965_v43  ;;  %v3712_v43 = vld [vmem:[%s4131_s1 + $0x90] sm:$0xff]  }
  0xa7   : > { %v335_v44 = vpop.permute.xlu0 %334  ;;  %v343_v45 = vpop.permute.xlu1 %342 }
  0xa8   : > { %2737 = vmatmul.mubr.msk.bf16.gmra.mrb[8].mxu0 %vm357_vm2, %v3558_v42  ;;  %v347_v46 = vsel %vm344_vm1, %v333_v15, %v335_v44  ;;  %v350_v48 = vsel %vm344_vm1, %v341_v26, %v343_v45 }
  0xa9   : > { %2954 = vmatprep.subr.bf16.mxu1 %v347_v46  ;;  %1018 = vmatprep.mubr.bf16.mxu0 %v3334_v4 }
  0xaa   : > { %2955 = vmatpush3.bf16.msra.mxu1 %v347_v46  ;;  %v3305_v46 = vld [vmem:[%s4131_s1 + $0x18] sm:$0xff]  }
  0xab   : > { %v1180_v49 = vpop.permute.xlu0 %1179  ;;  %2956 = vmatprep.subr.bf16.mxu1 %v350_v48  ;;  %v3571_v50 = vpop.permute.xlu1 %1181 }
  0xac   : > { %v1195_v52 = vsel %vm1193_vm4, %v1180_v49, %v3571_v50 }
  0xad   : > { %2705 = vmatmul.mubr.msk.bf16.gmra.mrb[8].mxu1 %vm357_vm2, %v3293_v47  ;;  %1218 = vmatprep.subr.bf16.mxu0 %v1195_v52 }
  0xae   : > { %2957 = vmatpush3.bf16.msra.mxu1 %v350_v48  ;;  %432 = vmatprep.mubr.bf16.mxu1 %v3334_v4 }
  0xaf   : > { %v1178_v53 = vpop.permute.xlu0 %1177  ;;  %546 = vmatprep.subr.bf16.mxu1 %v3391_v0  ;;  %v1188_v55 = vpop.permute.xlu1 %1187 }
  0xb0   : > { %v1194_v54 = vsel %vm1193_vm4, %v1178_v53, %v1180_v49  ;;  %2755 = vmatmul.mubr.msk.bf16.vlgmr.msra.gmra.mrb[0].mxu0 %vm357_vm2, %v3576_v51  ;;  %v3733_v49 = vld [vmem:[%s4131_s1 + $0x98] sm:$0xff]  }
  0xb1   : > { %1028 = vmatprep.mubr.bf16.mxu0 %v3334_v4  ;;  %1219 = vmatpush1.bf16.msra.mxu0 %v1194_v54 }
  0xb3   : > { %v3590_v57 = vpop.permute.xlu0 %1189  ;;  %v1186_v58 = vpop.permute.xlu1 %1185 }
  0xb4   : > { %v1198_v60 = vsel %vm1193_vm4, %v1188_v55, %v3590_v57  ;;  %v1197_v61 = vsel %vm1193_vm4, %v1186_v58, %v1188_v55 }
  0xb5   : > { %2706 = vmatmul.mubr.msk.bf16.gmra.mrb[12].mxu1 %vm357_vm2, %v3295_v56  ;;  %1220 = vmatprep.subr.bf16.mxu0 %v1198_v60 }
  0xb6   : > { %2958 = vmatprep.mubr.msk.bf16.mxu1 %vm357_vm2, %v3289_v30  ;;  %1221 = vmatpush1.bf16.msra.mxu0 %v1197_v61  ;;  %v3301_v30 = vld [vmem:[%s4131_s1 + $0x8] sm:$0xff]  }
  0xb7   : > { %v1412_v62 = vpop.permute.xlu0 %1411  ;;  %v3602_v63 = vpop.permute.xlu1 %1413 }
  0xb8   : > { %2756 = vmatmul.mubr.msk.bf16.gmra.mrb[4].mxu0 %vm357_vm2, %v3595_v59  ;;  %v1427_v0 = vsel %vm1425_vm5, %v1412_v62, %v3602_v63 }
  0xb9   : > { %1038 = vmatprep.mubr.bf16.mxu0 %v3334_v4  ;;  %1450 = vmatprep.subr.bf16.mxu0 %v1427_v0 }
  0xbb   : > { %v1410_v7 = vpop.permute.xlu0 %1409  ;;  %v1420_v8 = vpop.permute.xlu1 %1419 }
  0xbc   : > { %v1426_v26 = vsel %vm1425_vm5, %v1410_v7, %v1412_v62 }
  0xbd   : > { %2959 = vmatmul.mubr.msk.bf16.vlgmr.msra.gmra.mrb[16].mxu1 %vm357_vm2, %v3291_v38  ;;  %v3303_v38 = vld [vmem:[%s4131_s1 + $0x10] sm:$0xff]  }
  0xbe   : > { %2962 = vmatprep.mubr.msk.bf16.mxu1 %vm357_vm2, %v3293_v47  ;;  %547 = vmatpush1.bf16.msra.mxu1 %v3394_v1  ;;  %v3628_v1 = vld [vmem:[%s4131_s1 + $0x78] sm:$0xff]  }
  0xbf   : > { %v3617_v10 = vpop.permute.xlu0 %1421  ;;  %548 = vmatprep.subr.bf16.mxu1 %v3404_v3  ;;  %v1418_v12 = vpop.permute.xlu1 %1417 }
  0xc0   : > { %2757 = vmatmul.mubr.msk.bf16.gmra.mrb[8].mxu0 %vm357_vm2, %v3612_v9  ;;  %v1430_v28 = vsel %vm1425_vm5, %v1420_v8, %v3617_v10 }
  0xc1   : > { %1048 = vmatprep.mubr.bf16.mxu0 %v3334_v4 }
  0xc2   : > { %549 = vmatpush1.bf16.msra.mxu1 %v3420_v6 }
  0xc3   : > { %v720_v15 = vpop.permute.xlu0 %719  ;;  %2966 = vmatprep.subr.bf16.mxu1 %v3399_v2  ;;  %v728_v16 = vpop.permute.xlu1 %727 }
  0xc4   : > { %v3632_v3 = vsel %vm729_vm0, %v3492_v11, %v720_v15  ;;  %v3637_v17 = vsel %vm729_vm0, %v3508_v18, %v728_v16  ;;  %v3299_v11 = vld [vmem:[%s4131_s1] sm:$0xff]  }
  0xc5   : > { %2963 = vmatmul.mubr.msk.bf16.gmra.mrb[20].mxu1 %vm357_vm2, %v3295_v56  ;;  %v3655_v18 = vld [vmem:[%s4131_s1 + $0x80] sm:$0xff]  }
  0xc6   : > { %578 = vmatprep.mubr.bf16.mxu1 %v3334_v4  ;;  %v3751_v56 = vld [vmem:[%s4131_s1 + $0xa0] sm:$0xff]  }
  0xc7   : > { %v3640_v6 = vpop.permute.xlu0 %1643  ;;  %v3642_v19 = vpop.permute.xlu1 %1645 }
  0xc8   : > { %2758 = vmatmul.mubr.msk.bf16.gmra.mrb[12].mxu0 %vm357_vm2, %v3628_v1 }
  0xc9   : > { %1250 = vmatprep.mubr.bf16.mxu0 %v3334_v4 }
  0xcb   : > { %v3650_v21 = vpop.permute.xlu0 %1641  ;;  %v952_v22 = vpop.permute.xlu1 %951 }
  0xcc   : > { %v3660_v23 = vsel %vm961_vm3, %v3533_v32, %v952_v22  ;;  %v1659_v32 = vsel %vm1657_vm6, %v3640_v6, %v3642_v19  ;;  %v1658_v61 = vsel %vm1657_vm6, %v3650_v21, %v3640_v6  ;;  %v3316_v6 = vld [vmem:[%s4131_s1 + $0xe0] sm:$0xff]  }
  0xcd   : > { %2715 = vmatmul.mubr.msk.bf16.vlgmr.msra.gmra.mrb[0].mxu1 %vm357_vm2, %v3299_v11 }
  0xce   : > { %2967 = vmatpush3.bf16.msra.mxu1 %v3399_v2  ;;  %588 = vmatprep.mubr.bf16.mxu1 %v3334_v4  ;;  %v1429_v2 = vsel %vm1425_vm5, %v1418_v12, %v1420_v8  ;;  %v3814_v12 = vld [vmem:[%s4131_s1 + $0xb8] sm:$0xff]  }
  0xcf   : > { %v3665_v27 = vpop.permute.xlu0 %1651  ;;  %2968 = vmatprep.subr.bf16.mxu1 %v3412_v5  ;;  %v1654_v29 = vpop.permute.xlu1 %1653 }
  0xd0   : > { %2775 = vmatmul.mubr.msk.bf16.vlgmr.msra.gmra.mrb[0].mxu0 %vm357_vm2, %v3655_v18  ;;  %v1662_v62 = vsel %vm1657_vm6, %v3665_v27, %v1654_v29 }
  0xd1   : > { %1260 = vmatprep.mubr.bf16.mxu0 %v3334_v4  ;;  %1451 = vmatpush1.bf16.msra.mxu0 %v1426_v26  ;;  %v3318_v26 = vld [vmem:[%s4131_s1 + $0xf0] sm:$0xff]  }
  0xd2   : > { %2969 = vmatpush3.bf16.msra.mxu1 %v3412_v5  ;;  %1452 = vmatprep.subr.bf16.mxu0 %v1430_v28  ;;  %v3319_v28 = vld [vmem:[%s4131_s1 + $0xf8] sm:$0xff]  }
  0xd3   : > { %3062 = vmatprep.subr.bf16.mxu1 %v3496_v13  ;;  %v1650_v31 = vpop.permute.xlu0 %1649  ;;  %v960_v34 = vpop.permute.xlu1 %959 }
  0xd4   : > { %v3690_v5 = vsel %vm961_vm3, %v3551_v39, %v960_v34  ;;  %v1661_v0 = vsel %vm1657_vm6, %v1650_v31, %v3665_v27  ;;  %v3320_v31 = vld [vmem:[%s4131_s1 + $0x100] sm:$0xff]   ;;  %v3321_v34 = vld [vmem:[%s4131_s1 + $0x108] sm:$0xff]  }
  0xd5   : > { %2716 = vmatmul.mubr.msk.bf16.gmra.mrb[4].mxu1 %vm357_vm2, %v3301_v30  ;;  %1453 = vmatpush1.bf16.msra.mxu0 %v1429_v2 }
  0xd6   : > { %598 = vmatprep.mubr.bf16.mxu1 %v3334_v4  ;;  %1682 = vmatprep.subr.bf16.mxu0 %v1659_v32 }
  0xd7   : > { %v1184_v13 = vpop.permute.xlu0 %1183  ;;  %v1192_v36 = vpop.permute.xlu1 %1191 }
  0xd8   : > { %2776 = vmatmul.mubr.msk.bf16.gmra.mrb[4].mxu0 %vm357_vm2, %v3685_v35  ;;  %v3697_v37 = vsel %vm1193_vm4, %v3571_v50, %v1184_v13  ;;  %v3705_v39 = vsel %vm1193_vm4, %v3590_v57, %v1192_v36  ;;  %v3323_v13 = vld [vmem:[%s4131_s1 + $0x118] sm:$0xff]  }
  0xd9   : > { %1270 = vmatprep.mubr.bf16.mxu0 %v3334_v4 }
  0xdb   : > { %v3707_v40 = vpop.permute.xlu0 %1875  ;;  %v1878_v41 = vpop.permute.xlu1 %1877 }
  0xdd   : > { %2717 = vmatmul.mubr.msk.bf16.gmra.mrb[8].mxu1 %vm357_vm2, %v3303_v38 }
  0xde   : > { %608 = vmatprep.mubr.bf16.mxu1 %v3334_v4 }
  0xdf   : > { %v3716_v44 = vpop.permute.xlu0 %1873  ;;  %v1416_v45 = vpop.permute.xlu1 %1415 }
  0xe0   : > { %2777 = vmatmul.mubr.msk.bf16.gmra.mrb[8].mxu0 %vm357_vm2, %v3712_v43  ;;  %v3726_v47 = vsel %vm1425_vm5, %v3602_v63, %v1416_v45 }
  0xe1   : > { %1280 = vmatprep.mubr.bf16.mxu0 %v3334_v4 }
  0xe3   : > { %v3728_v48 = vpop.permute.xlu0 %1883  ;;  %v3735_v50 = vpop.permute.xlu1 %1885 }
  0xe5   : > { %2718 = vmatmul.mubr.msk.bf16.gmra.mrb[12].mxu1 %vm357_vm2, %v3305_v46 }
  0xe6   : > { %2970 = vmatprep.mubr.msk.bf16.mxu1 %vm357_vm2, %v3299_v11 }
  0xe7   : > { %v3739_v52 = vpop.permute.xlu0 %1881  ;;  %v1424_v53 = vpop.permute.xlu1 %1423 }
  0xe8   : > { %2778 = vmatmul.mubr.msk.bf16.gmra.mrb[12].mxu0 %vm357_vm2, %v3733_v49  ;;  %v3746_v54 = vsel %vm1425_vm5, %v3617_v10, %v1424_v53  ;;  %v3799_v10 = vld [vmem:[%s4131_s1 + $0xb0] sm:$0xff]   ;;  %v1893_v15 = vsel %vm1889_vm7, %v3739_v52, %v3728_v48  ;;  %v2406_v53 = vlaneseq }
  0xe9   : > { %1482 = vmatprep.mubr.bf16.mxu0 %v3334_v4 }
  0xeb   : > { %v1648_v55 = vpop.permute.xlu0 %1647  ;;  %v1656_v57 = vpop.permute.xlu1 %1655 }
  0xec   : > { %v3755_v58 = vsel %vm1657_vm6, %v3642_v19, %v1648_v55  ;;  %v3759_v60 = vsel %vm1657_vm6, %v1654_v29, %v1656_v57 }
  0xed   : > { %2971 = vmatmul.mubr.msk.bf16.vlgmr.msra.gmra.mrb[16].mxu1 %vm357_vm2, %v3301_v30 }
  0xee   : > { %3064 = vmatpush1.bf16.msra.mxu1 %v3500_v14  ;;  %2974 = vmatprep.mubr.msk.bf16.mxu1 %vm357_vm2, %v3303_v38  ;;  %v1891_v14 = vsel %vm1889_vm7, %v3707_v40, %v1878_v41 }
  0xef   : > { %3063 = vmatprep.subr.bf16.mxu1 %v3512_v20  ;;  %v3771_v63 = vpop.permute.xlu1 %2109  ;;  %v3783_v20 = vld [vmem:[%s4131_s1 + $0xa8] sm:$0xff]   ;;  %v2108_v16 = vpop.permute.xlu0 %2107 }
  0xf0   : > { %2795 = vmatmul.mubr.msk.bf16.vlgmr.msra.gmra.mrb[0].mxu0 %vm357_vm2, %v3751_v56 }
  0xf1   : > { %1492 = vmatprep.mubr.bf16.mxu0 %v3334_v4  ;;  %1683 = vmatpush1.bf16.msra.mxu0 %v1658_v61 }
  0xf2   : > { %3065 = vmatpush1.bf16.msra.mxu1 %v3517_v24  ;;  %1684 = vmatprep.subr.bf16.mxu0 %v1662_v62  ;;  %v3309_v24 = vld [vmem:[%s4131_s1 + $0x58] sm:$0xff]  }
  0xf3   : > { %2978 = vmatprep.subr.bf16.mxu1 %v3632_v3  ;;  %v1880_v7 = vpop.permute.xlu1 %1879 }
  0xf4   : > { %v3787_v8 = vsel %vm1889_vm7, %v1878_v41, %v1880_v7 }
  0xf5   : > { %2975 = vmatmul.mubr.msk.bf16.gmra.mrb[20].mxu1 %vm357_vm2, %v3305_v46  ;;  %1685 = vmatpush1.bf16.msra.mxu0 %v1661_v0 }
  0xf6   : > { %816 = vmatprep.mubr.bf16.mxu1 %v3334_v4  ;;  %1914 = vmatprep.subr.bf16.mxu0 %v1891_v14 }
  0xf7   : > { %v2118_v19 = vpop.permute.xlu1 %2117 }
  0xf8   : > { %2796 = vmatmul.mubr.msk.bf16.gmra.mrb[4].mxu0 %vm357_vm2, %v3783_v20 }
  0xf9   : > { %1502 = vmatprep.mubr.bf16.mxu0 %v3334_v4 }
  0xfc   : > { %v1888_v27 = vpop.permute.xlu1 %1887 }
  0xfd   : > { %2738 = vmatmul.mubr.msk.bf16.vlgmr.msra.gmra.mrb[12].mxu1 %vm357_vm2, %v3309_v24  ;;  %v1895_v29 = vsel %vm1889_vm7, %v3735_v50, %v1888_v27 }
  0xfe   : > { %2979 = vmatpush3.bf16.msra.mxu1 %v3632_v3  ;;  %2982 = vmatprep.mubr.msk.bf16.mxu1 %vm357_vm2, %v3522_v25  ;;  %v3830_v25 = vld [vmem:[%s4131_s1 + $0xc0] sm:$0xff]   ;;  %v2123_v3 = vsel %vm2121_vm8, %v2108_v16, %v3771_v63 }
  0xff   : > { %2980 = vmatprep.subr.bf16.mxu1 %v3637_v17 }
 0x100   : > { %2797 = vmatmul.mubr.msk.bf16.gmra.mrb[8].mxu0 %vm357_vm2, %v3799_v10  ;;  %v2120_v32 = vpop.permute.xlu1 %2119 }
 0x101   : > { %1512 = vmatprep.mubr.bf16.mxu0 %v3334_v4 }
 0x102   : > { %2981 = vmatpush3.bf16.msra.mxu1 %v3637_v17  ;;  %v2106_v17 = vpop.permute.xlu0 %2105 }
 0x103   : > { %2990 = vmatprep.subr.bf16.mxu1 %v3660_v23  ;;  %v2122_v11 = vsel %vm2121_vm8, %v2106_v17, %v2108_v16 }
 0x105   : > { %2983 = vmatmul.mubr.msk.bf16.vlgmr.msra.gmra.mrb[16].mxu1 %vm357_vm2, %v3538_v33  ;;  %v1890_v33 = vsel %vm1889_vm7, %v3716_v44, %v3707_v40 }
 0x106   : > { %2991 = vmatpush3.bf16.msra.mxu1 %v3660_v23  ;;  %2986 = vmatprep.mubr.msk.bf16.mxu1 %vm357_vm2, %v3558_v42  ;;  %v1894_v42 = vsel %vm1889_vm7, %v3728_v48, %v3735_v50  ;;  %v3317_v23 = vld [vmem:[%s4131_s1 + $0xe8] sm:$0xff]  }
 0x107   : > { %2992 = vmatprep.subr.bf16.mxu1 %v3690_v5 }
 0x108   : > { %2798 = vmatmul.mubr.msk.bf16.gmra.mrb[12].mxu0 %vm357_vm2, %v3814_v12 }
 0x109   : > { %1714 = vmatprep.mubr.bf16.mxu0 %v3334_v4 }
 0x10a   : > { %2993 = vmatpush3.bf16.msra.mxu1 %v3690_v5  ;;  %v3322_v5 = vld [vmem:[%s4131_s1 + $0x110] sm:$0xff]  }
 0x10b   : > { %3002 = vmatprep.subr.bf16.mxu1 %v3697_v37 }
 0x10d   : > { %2987 = vmatmul.mubr.msk.bf16.gmra.mrb[20].mxu1 %vm357_vm2, %v3309_v24 }
 0x10e   : > { %2994 = vmatprep.mubr.msk.bf16.mxu1 %vm357_vm2, %v3576_v51  ;;  %v3313_v51 = vld [vmem:[%s4131_s1 + $0xc8] sm:$0xff]  }
 0x110   : > { %2815 = vmatmul.mubr.msk.bf16.vlgmr.msra.gmra.mrb[0].mxu0 %vm357_vm2, %v3830_v25 }
 0x111   : > { %1724 = vmatprep.mubr.bf16.mxu0 %v3334_v4  ;;  %1915 = vmatpush1.bf16.msra.mxu0 %v1890_v33 }
 0x112   : > { %1916 = vmatprep.subr.bf16.mxu0 %v1894_v42 }
 0x115   : > { %2995 = vmatmul.mubr.msk.bf16.vlgmr.msra.gmra.mrb[16].mxu1 %vm357_vm2, %v3595_v59  ;;  %1917 = vmatpush1.bf16.msra.mxu0 %v1893_v15  ;;  %v3314_v59 = vld [vmem:[%s4131_s1 + $0xd0] sm:$0xff]  }
 0x116   : > { %3003 = vmatpush3.bf16.msra.mxu1 %v3697_v37  ;;  %2998 = vmatprep.mubr.msk.bf16.mxu1 %vm357_vm2, %v3612_v9  ;;  %v3315_v9 = vld [vmem:[%s4131_s1 + $0xd8] sm:$0xff]  }
 0x117   : > { %3004 = vmatprep.subr.bf16.mxu1 %v3705_v39  ;;  %2146 = vmatprep.subr.bf16.mxu0 %v2123_v3 }
 0x118   : > { %2816 = vmatmul.mubr.msk.bf16.gmra.mrb[4].mxu0 %vm357_vm2, %v3313_v51 }
 0x119   : > { %1734 = vmatprep.mubr.bf16.mxu0 %v3334_v4 }
 0x11a   : > { %3005 = vmatpush3.bf16.msra.mxu1 %v3705_v39 }
 0x11b   : > { %3014 = vmatprep.subr.bf16.mxu1 %v3726_v47 }
 0x11d   : > { %2999 = vmatmul.mubr.msk.bf16.gmra.mrb[20].mxu1 %vm357_vm2, %v3628_v1  ;;  %v2116_v1 = vpop.permute.xlu0 %2115 }
 0x11e   : > { %3006 = vmatprep.mubr.msk.bf16.mxu1 %vm357_vm2, %v3655_v18  ;;  %v2126_v21 = vsel %vm2121_vm8, %v2116_v1, %v2118_v19 }
 0x120   : > { %2817 = vmatmul.mubr.msk.bf16.gmra.mrb[8].mxu0 %vm357_vm2, %v3314_v59 }
 0x121   : > { %1744 = vmatprep.mubr.bf16.mxu0 %v3334_v4  ;;  %v2114_v22 = vpop.permute.xlu0 %2113 }
 0x122   : > { %v2125_v18 = vsel %vm2121_vm8, %v2114_v22, %v2116_v1 }
 0x125   : > { %3007 = vmatmul.mubr.msk.bf16.vlgmr.msra.gmra.mrb[16].mxu1 %vm357_vm2, %v3685_v35  ;;  %v2112_v30 = vpop.permute.xlu0 %2111  ;;  %v2127_v35 = vsel %vm2121_vm8, %v2118_v19, %v2120_v32 }
 0x126   : > { %3015 = vmatpush3.bf16.msra.mxu1 %v3726_v47  ;;  %3010 = vmatprep.mubr.msk.bf16.mxu1 %vm357_vm2, %v3712_v43  ;;  %v2124_v2 = vsel %vm2121_vm8, %v3771_v63, %v2112_v30 }
 0x127   : > { %3016 = vmatprep.subr.bf16.mxu1 %v3746_v54 }
 0x128   : > { %2818 = vmatmul.mubr.msk.bf16.gmra.mrb[12].mxu0 %vm357_vm2, %v3315_v9 }
 0x129   : > { %1946 = vmatprep.mubr.bf16.mxu0 %v3334_v4 }
 0x12a   : > { %3017 = vmatpush3.bf16.msra.mxu1 %v3746_v54  ;;  %v3975_v54 = vshrl.u32 %v2406_v53, 7 }
 0x12b   : > { %3026 = vmatprep.subr.bf16.mxu1 %v3755_v58 }
 0x12c   : > { %v2408_v55 = vsub.s32 0, %v3975_v54  ;;  %v2412_v57 = vsub.s32 1, %v3975_v54 }
 0x12d   : > { %3011 = vmatmul.mubr.msk.bf16.gmra.mrb[20].mxu1 %vm357_vm2, %v3733_v49 }
 0x12e   : > { %3018 = vmatprep.mubr.msk.bf16.mxu1 %vm357_vm2, %v3751_v56  ;;  %v3981_v56 = vld [vmem:[%s4132_s2] sm:$0x7] }
 0x12f   : > { %v3989_v61 = vrot.slane %v3981_v56, %v2412_v57 }
 0x130   : > { %2835 = vmatmul.mubr.msk.bf16.vlgmr.msra.gmra.mrb[0].mxu0 %vm357_vm2, %v3316_v6 }
 0x131   : > { %1956 = vmatprep.mubr.bf16.mxu0 %v3334_v4  ;;  %2147 = vmatpush1.bf16.msra.mxu0 %v2122_v11 }
 0x132   : > { %2148 = vmatprep.subr.bf16.mxu0 %v2126_v21 }
 0x135   : > { %3019 = vmatmul.mubr.msk.bf16.vlgmr.msra.gmra.mrb[16].mxu1 %vm357_vm2, %v3783_v20  ;;  %2149 = vmatpush1.bf16.msra.mxu0 %v2125_v18 }
 0x136   : > { %3027 = vmatpush3.bf16.msra.mxu1 %v3755_v58  ;;  %3022 = vmatprep.mubr.msk.bf16.mxu1 %vm357_vm2, %v3799_v10  ;;  %v3986_v58 = vrot.slane %v3981_v56, %v2408_v55 }
 0x137   : > { %3028 = vmatprep.subr.bf16.mxu1 %v3759_v60 }
 0x138   : > { %2836 = vmatmul.mubr.msk.bf16.gmra.mrb[4].mxu0 %vm357_vm2, %v3317_v23 }
 0x139   : > { %1966 = vmatprep.mubr.bf16.mxu0 %v3334_v4 }
 0x13a   : > { %3029 = vmatpush3.bf16.msra.mxu1 %v3759_v60 }
 0x13b   : > { %3038 = vmatprep.subr.bf16.mxu1 %v3787_v8 }
 0x13d   : > { %3023 = vmatmul.mubr.msk.bf16.gmra.mrb[20].mxu1 %vm357_vm2, %v3814_v12 }
 0x13e   : > { %3030 = vmatprep.mubr.msk.bf16.mxu1 %vm357_vm2, %v3830_v25 }
 0x140   : > { %2837 = vmatmul.mubr.msk.bf16.gmra.mrb[8].mxu0 %vm357_vm2, %v3318_v26 }
 0x141   : > { %1976 = vmatprep.mubr.bf16.mxu0 %v3334_v4 }
 0x145   : > { %3031 = vmatmul.mubr.msk.bf16.vlgmr.msra.gmra.mrb[16].mxu1 %vm357_vm2, %v3313_v51 }
 0x146   : > { %3039 = vmatpush3.bf16.msra.mxu1 %v3787_v8  ;;  %3034 = vmatprep.mubr.msk.bf16.mxu1 %vm357_vm2, %v3314_v59 }
 0x147   : > { %3040 = vmatprep.subr.bf16.mxu1 %v1895_v29 }
 0x148   : > { %2838 = vmatmul.mubr.msk.bf16.gmra.mrb[12].mxu0 %vm357_vm2, %v3319_v28 }
 0x149   : > { %2178 = vmatprep.mubr.bf16.mxu0 %v3334_v4 }
 0x14a   : > { %3041 = vmatpush3.bf16.msra.mxu1 %v1895_v29 }
 0x14b   : > { %3050 = vmatprep.subr.bf16.mxu1 %v2124_v2 }
 0x14d   : > { %3035 = vmatmul.mubr.msk.bf16.gmra.mrb[20].mxu1 %vm357_vm2, %v3315_v9 }
 0x14e   : > { %3042 = vmatprep.mubr.msk.bf16.mxu1 %vm357_vm2, %v3316_v6 }
 0x150   : > { %2855 = vmatmul.mubr.msk.bf16.vlgmr.msra.gmra.mrb[0].mxu0 %vm357_vm2, %v3320_v31 }
 0x151   : > { %2188 = vmatprep.mubr.bf16.mxu0 %v3334_v4 }
 0x155   : > { %3043 = vmatmul.mubr.msk.bf16.vlgmr.msra.gmra.mrb[16].mxu1 %vm357_vm2, %v3317_v23 }
 0x156   : > { %3051 = vmatpush3.bf16.msra.mxu1 %v2124_v2  ;;  %3046 = vmatprep.mubr.msk.bf16.mxu1 %vm357_vm2, %v3318_v26 }
 0x157   : > { %3052 = vmatprep.subr.bf16.mxu1 %v2127_v35 }
 0x158   : > { %2856 = vmatmul.mubr.msk.bf16.gmra.mrb[4].mxu0 %vm357_vm2, %v3321_v34 }
 0x159   : > { %2198 = vmatprep.mubr.bf16.mxu0 %v3334_v4 }
 0x15a   : > { %3053 = vmatpush3.bf16.msra.mxu1 %v2127_v35 }
 0x15d   : > { %3047 = vmatmul.mubr.msk.bf16.gmra.mrb[20].mxu1 %vm357_vm2, %v3319_v28 }
 0x15e   : > { %3054 = vmatprep.mubr.msk.bf16.mxu1 %vm357_vm2, %v3320_v31 }
 0x160   : > { %2857 = vmatmul.mubr.msk.bf16.gmra.mrb[8].mxu0 %vm357_vm2, %v3322_v5 }
 0x161   : > { %2208 = vmatprep.mubr.bf16.mxu0 %v3334_v4 }
 0x165   : > { %3055 = vmatmul.mubr.msk.bf16.vlgmr.msra.gmra.mrb[16].mxu1 %vm357_vm2, %v3321_v34 }
 0x166   : > { %3058 = vmatprep.mubr.msk.bf16.mxu1 %vm357_vm2, %v3322_v5 }
 0x168   : > { %2858 = vmatmul.mubr.msk.bf16.gmra.mrb[12].mxu0 %vm357_vm2, %v3323_v13 }
 0x16d   : > { %3059 = vmatmul.mubr.msk.bf16.gmra.mrb[20].mxu1 %vm357_vm2, %v3323_v13  ;;  %v2416_v13 = vsub.s32 2, %v3975_v54 }
 0x16f   : > { %v4024_v54 = vrot.slane %v3981_v56, %v2416_v13 }
 0x1a0   : > { %v580_v36 = vpop.f32.mrb[0].mxu1 }
 0x1a1   : > { %v582_v37 = vpop.f32.mrb[1].mxu1 }
 0x1a2   : > { %v584_v38 = vpop.f32.mrb[2].mxu1 }
 0x1a3   : > { %v586_v39 = vpop.f32.mrb[3].mxu1 }
 0x1a8   : > { %v590_v40 = vpop.f32.mrb[4].mxu1 }
 0x1a9   : > { %v592_v41 = vpop.f32.mrb[5].mxu1 }
 0x1aa   : > { %v594_v4 = vpop.f32.mrb[6].mxu1 }
 0x1ab   : > { %v596_v43 = vpop.f32.mrb[7].mxu1 }
 0x1b0   : > { %v3959_v44 = vpop.f32.mrb[8].mxu1 }
 0x1b1   : > { %v3961_v45 = vpop.f32.mrb[9].mxu1 }
 0x1b2   : > { %v3963_v46 = vpop.f32.mrb[10].mxu1 }
 0x1b3   : > { %v3965_v47 = vpop.f32.mrb[11].mxu1 }
 0x1d0   : > { %v3967_v48 = vpop.f32.mrb[12].mxu1 }
 0x1d1   : > { %v3969_v49 = vpop.f32.mrb[13].mxu1 }
 0x1d2   : > { %v3971_v50 = vpop.f32.mrb[14].mxu1 }
 0x1d3   : > { %v3973_v52 = vpop.f32.mrb[15].mxu1 }
 0x223   : > { %v2180_v60 = vpop.f32.mrb[0].mxu0 }
 0x224   : > { %v3066_v62 = vadd.f32 %v2180_v60, %v580_v36  ;;  %v2182_v63 = vpop.f32.mrb[1].mxu0 }
 0x225   : > { %v3067_v0 = vadd.f32 %v2182_v63, %v582_v37  ;;  %v2184_v14 = vpop.f32.mrb[2].mxu0 }
 0x226   : > { %v2421_v20 = vmul.f32 %v3066_v62, %v3986_v58  ;;  %v3068_v7 = vadd.f32 %v2184_v14, %v584_v38  ;;  %v2186_v8 = vpop.f32.mrb[3].mxu0 }
 0x227   : > { %v2884_v24 = vpack.c.bf16 %v3067_v0, %v3066_v62  ;;  %v2422_v10 = vmul.f32 %v3067_v0, %v3989_v61  ;;  %v3069_v12 = vadd.f32 %v2186_v8, %v586_v39 }
 0x228   : > { %v2486_v25 = vmul.f32 %v3066_v62, %v2421_v20  ;;  %v2424_v33 = vmul.f32 %v3068_v7, %v3986_v58 }
 0x229   : > { %2388 = vst [vmem:[%s3994_s21] sm:$0xff] %v2884_v24  ;;  %v2487_v42 = vmul.f32 %v3067_v0, %v2422_v10  ;;  %v2886_v15 = vpack.c.bf16 %v3069_v12, %v3068_v7  ;;  %v2425_v16 = vmul.f32 %v3069_v12, %v3989_v61  ;;  %v4001_v51 = vadd.f32 %v2422_v10, %v2421_v20 }
 0x22a   : > { %v2489_v3 = vmul.f32 %v3068_v7, %v2424_v33 }
 0x22b   : > { %2390 = vst [vmem:[%s3994_s21 + $0xc] sm:$0xff] %v2886_v15  ;;  %v2490_v59 = vmul.f32 %v3069_v12, %v2425_v16  ;;  %v2190_v9 = vpop.f32.mrb[4].mxu0  ;;  %v4004_v17 = vadd.f32 %v2425_v16, %v2424_v33  ;;  %v4006_v1 = vadd.f32 %v2487_v42, %v2486_v25 }
 0x22c   : > { %v3070_v6 = vadd.f32 %v2190_v9, %v590_v40  ;;  %v2192_v19 = vpop.f32.mrb[5].mxu0 }
 0x22d   : > { %v3071_v11 = vadd.f32 %v2192_v19, %v592_v41  ;;  %v2194_v21 = vpop.f32.mrb[6].mxu0  ;;  %v4008_v22 = vadd.f32 %v2490_v59, %v2489_v3 }
 0x22e   : > { %v2427_v18 = vmul.f32 %v3070_v6, %v3986_v58  ;;  %v3072_v23 = vadd.f32 %v2194_v21, %v594_v4  ;;  %v2196_v26 = vpop.f32.mrb[7].mxu0 }
 0x22f   : > { %v2888_v27 = vpack.c.bf16 %v3071_v11, %v3070_v6  ;;  %v2428_v28 = vmul.f32 %v3071_v11, %v3989_v61  ;;  %v3073_v29 = vadd.f32 %v2196_v26, %v596_v43 }
 0x230   : > { %v2492_v30 = vmul.f32 %v3070_v6, %v2427_v18  ;;  %v2430_v2 = vmul.f32 %v3072_v23, %v3986_v58 }
 0x231   : > { %2392 = vst [vmem:[%s3994_s21 + $0x18] sm:$0xff] %v2888_v27  ;;  %v2493_v31 = vmul.f32 %v3071_v11, %v2428_v28  ;;  %v2890_v32 = vpack.c.bf16 %v3073_v29, %v3072_v23  ;;  %v2431_v34 = vmul.f32 %v3073_v29, %v3989_v61  ;;  %v2453_v35 = vadd.f32 %v2428_v28, %v2427_v18 }
 0x232   : > { %v2495_v5 = vmul.f32 %v3072_v23, %v2430_v2 }
 0x233   : > { %2394 = vst [vmem:[%s3994_s21 + $0x24] sm:$0xff] %v2890_v32  ;;  %v2496_v36 = vmul.f32 %v3073_v29, %v2431_v34  ;;  %v2200_v37 = vpop.f32.mrb[8].mxu0  ;;  %v2518_v38 = vadd.f32 %v2493_v31, %v2492_v30  ;;  %v2457_v39 = vadd.f32 %v2431_v34, %v2430_v2 }
 0x234   : > { %v3074_v40 = vadd.f32 %v2200_v37, %v3959_v44  ;;  %v2202_v41 = vpop.f32.mrb[9].mxu0 }
 0x235   : > { %v3075_v4 = vadd.f32 %v2202_v41, %v3961_v45  ;;  %v2204_v43 = vpop.f32.mrb[10].mxu0  ;;  %v4019_v53 = vadd.f32 %v2496_v36, %v2495_v5 }
 0x236   : > { %v2433_v55 = vmul.f32 %v3074_v40, %v3986_v58  ;;  %v3076_v57 = vadd.f32 %v2204_v43, %v3963_v46  ;;  %v2206_v60 = vpop.f32.mrb[11].mxu0 }
 0x237   : > { %v2892_v62 = vpack.c.bf16 %v3075_v4, %v3074_v40  ;;  %v2434_v63 = vmul.f32 %v3075_v4, %v3989_v61  ;;  %v3077_v44 = vadd.f32 %v2206_v60, %v3965_v47 }
 0x238   : > { %v4028_v0 = vmul.f32 %v3074_v40, %v2433_v55  ;;  %v4031_v45 = vmul.f32 %v3076_v57, %v3986_v58  ;;  %v3056_v14 = vpop.f32.mrb[16].mxu1 }
 0x239   : > { %2396 = vst [vmem:[%s3994_s21 + $0x30] sm:$0xff] %v2892_v62  ;;  %v4034_v20 = vmul.f32 %v3075_v4, %v2434_v63  ;;  %v2894_v46 = vpack.c.bf16 %v3077_v44, %v3076_v57  ;;  %v4037_v56 = vmul.f32 %v3077_v44, %v3989_v61  ;;  %v2889_v7 = vpack.c.bf16 %v3056_v14, %v3056_v14  ;;  %v2253_v8 = vpop.f32.mrb[17].mxu1 }
 0x23a   : > { %v4040_v24 = vmul.f32 %v3076_v57, %v4031_v45  ;;  %v2885_v47 = vpack.c.bf16 %v2253_v8, %v2253_v8  ;;  %v3057_v10 = vpop.f32.mrb[18].mxu1  ;;  %v2429_v12 = vmul.f32 %v3056_v14, %v4024_v54  ;;  %v2423_v25 = vmul.f32 %v4024_v54, %v2253_v8 }
 0x23b   : > { %2398 = vst [vmem:[%s3994_s21 + $0x3c] sm:$0xff] %v2894_v46  ;;  %v4046_v33 = vmul.f32 %v3077_v44, %v4037_v56  ;;  %2393 = vst [vmem:[%s3994_s21 + $0x20] sm:$0xf] %v2889_v7  ;;  %v2891_v42 = vpack.c.bf16 %v3057_v10, %v3057_v10  ;;  %v2210_v15 = vpop.f32.mrb[12].mxu0  ;;  %v2256_v16 = vpop.f32.mrb[19].mxu1  ;;  %v2432_v3 = vmul.f32 %v3057_v10, %v4024_v54 }
 0x23c   : > { %v2461_v59 = vadd.f32 %v2434_v63, %v2433_v55  ;;  %2389 = vst [vmem:[%s3994_s21 + $0x8] sm:$0xf] %v2885_v47  ;;  %v3078_v9 = vadd.f32 %v2210_v15, %v3967_v48  ;;  %v2887_v6 = vpack.c.bf16 %v2256_v16, %v2256_v16  ;;  %v2212_v19 = vpop.f32.mrb[13].mxu0  ;;  %v2454_v11 = vadd.f32 %v2453_v35, %v2429_v12 }
 0x23d   : > { %v2494_v21 = vmul.f32 %v3056_v14, %v2429_v12  ;;  %2395 = vst [vmem:[%s3994_s21 + $0x2c] sm:$0xf] %v2891_v42  ;;  %v3079_v18 = vadd.f32 %v2212_v19, %v3969_v49  ;;  %v2214_v23 = vpop.f32.mrb[14].mxu0  ;;  %v2446_v26 = vadd.f32 %v4001_v51, %v2423_v25  ;;  %v2426_v27 = vmul.f32 %v4024_v54, %v2256_v16 }
 0x23e   : > { %v2458_v28 = vadd.f32 %v2457_v39, %v2432_v3  ;;  %v2439_v29 = vmul.f32 %v3078_v9, %v3986_v58  ;;  %2391 = vst [vmem:[%s3994_s21 + $0x14] sm:$0xf] %v2887_v6  ;;  %v3080_v30 = vadd.f32 %v2214_v23, %v3971_v50  ;;  %2455 = vadd.xlane.f32.xlu0 %v2454_v11  ;;  %v2216_v48 = vpop.f32.mrb[15].mxu0 }
 0x23f   : > { %v2519_v2 = vadd.f32 %v2518_v38, %v2494_v21  ;;  %v2488_v31 = vmul.f32 %v2423_v25, %v2253_v8  ;;  %v2896_v32 = vpack.c.bf16 %v3079_v18, %v3078_v9  ;;  %v2440_v34 = vmul.f32 %v3079_v18, %v3989_v61 }
 0x240   : > { %v3081_v49 = vadd.f32 %v2216_v48, %v3973_v52  ;;  %v2450_v51 = vadd.f32 %v4004_v17, %v2426_v27  ;;  %v2504_v35 = vmul.f32 %v3078_v9, %v2439_v29  ;;  %v2442_v5 = vmul.f32 %v3080_v30, %v3986_v58  ;;  %v3060_v13 = vpop.f32.mrb[20].mxu1 }
 0x241   : > { %2520 = vadd.xlane.f32.xlu1 %v2519_v2  ;;  %v2511_v36 = vadd.f32 %v4006_v1, %v2488_v31  ;;  %v2497_v50 = vmul.f32 %v3057_v10, %v2432_v3  ;;  %2400 = vst [vmem:[%s3994_s21 + $0x48] sm:$0xff] %v2896_v32  ;;  %v2505_v37 = vmul.f32 %v3079_v18, %v2440_v34  ;;  %v2269_v52 = vpop.f32.mrb[21].mxu1 }
 0x242   : > { %v2898_v38 = vpack.c.bf16 %v3081_v49, %v3080_v30  ;;  %v2443_v39 = vmul.f32 %v3081_v49, %v3989_v61  ;;  %v2897_v40 = vpack.c.bf16 %v3060_v13, %v3060_v13  ;;  %v2507_v41 = vmul.f32 %v3080_v30, %v2442_v5  ;;  %2447 = vadd.xlane.f32.xlu0 %v2446_v26  ;;  %v3061_v4 = vpop.f32.mrb[22].mxu1 }
 0x243   : > { %v2893_v17 = vpack.c.bf16 %v2269_v52, %v2269_v52  ;;  %v2523_v58 = vadd.f32 %v4019_v53, %v2497_v50  ;;  %v2435_v43 = vmul.f32 %v4024_v54, %v2269_v52  ;;  %v2899_v55 = vpack.c.bf16 %v3061_v4, %v3061_v4  ;;  %v2272_v57 = vpop.f32.mrb[23].mxu1 }
 0x244   : > { %2402 = vst [vmem:[%s3994_s21 + $0x54] sm:$0xff] %v2898_v38  ;;  %v2508_v1 = vmul.f32 %v3081_v49, %v2443_v39  ;;  %2401 = vst [vmem:[%s3994_s21 + $0x50] sm:$0xf] %v2897_v40  ;;  %v2491_v60 = vmul.f32 %v2426_v27, %v2256_v16  ;;  %v2526_v61 = vadd.f32 %v4034_v20, %v4028_v0 }
 0x245   : > { %2397 = vst [vmem:[%s3994_s21 + $0x38] sm:$0xf] %v2893_v17  ;;  %2451 = vadd.xlane.f32.xlu1 %v2450_v51  ;;  %v2895_v62 = vpack.c.bf16 %v2272_v57, %v2272_v57  ;;  %v2438_v63 = vmul.f32 %v4024_v54, %v2272_v57  ;;  %v2462_v44 = vadd.f32 %v2461_v59, %v2435_v43  ;;  %2403 = vst [vmem:[%s3994_s21 + $0x5c] sm:$0xf] %v2899_v55 }
 0x246   : > { %v2500_v14 = vmul.f32 %v2435_v43, %v2269_v52  ;;  %v2515_v53 = vadd.f32 %v4008_v22, %v2491_v60  ;;  %v2465_v46 = vadd.f32 %v4037_v56, %v4031_v45  ;;  %v2441_v7 = vmul.f32 %v3060_v13, %v4024_v54  ;;  %2459 = vadd.xlane.f32.xlu0 %v2458_v28 }
 0x247   : > { %v2469_v8 = vadd.f32 %v2440_v34, %v2439_v29  ;;  %2399 = vst [vmem:[%s3994_s21 + $0x44] sm:$0xf] %v2895_v62  ;;  %v2503_v47 = vmul.f32 %v2438_v63, %v2272_v57  ;;  %v2530_v20 = vadd.f32 %v4046_v33, %v4040_v24  ;;  %v2534_v10 = vadd.f32 %v2505_v37, %v2504_v35 }
 0x248   : > { %v2527_v0 = vadd.f32 %v2526_v61, %v2500_v14  ;;  %v2466_v12 = vadd.f32 %v2465_v46, %v2438_v63  ;;  %v2506_v42 = vmul.f32 %v3060_v13, %v2441_v7  ;;  %v2444_v15 = vmul.f32 %v3061_v4, %v4024_v54 }
 0x249   : > { %v2470_v25 = vadd.f32 %v2469_v8, %v2441_v7  ;;  %2512 = vadd.xlane.f32.xlu1 %v2511_v36  ;;  %v2531_v22 = vadd.f32 %v2530_v20, %v2503_v47  ;;  %v2473_v16 = vadd.f32 %v2443_v39, %v2442_v5  ;;  %v2538_v45 = vadd.f32 %v2508_v1, %v2507_v41 }
 0x24a   : > { %v2535_v56 = vadd.f32 %v2534_v10, %v2506_v42  ;;  %v2509_v3 = vmul.f32 %v3061_v4, %v2444_v15  ;;  %2524 = vadd.xlane.f32.xlu0 %v2523_v58 }
 0x24b   : > { %v2474_v59 = vadd.f32 %v2473_v16, %v2444_v15 }
 0x24c   : > { %v2539_v9 = vadd.f32 %v2538_v45, %v2509_v3 }
 0x24d   : > { %2463 = vadd.xlane.f32.xlu1 %v2462_v44 }
 0x24e   : > { %2516 = vadd.xlane.f32.xlu0 %v2515_v53 }
 0x251   : > { %2528 = vadd.xlane.f32.xlu1 %v2527_v0 }
 0x252   : > { %2467 = vadd.xlane.f32.xlu0 %v2466_v12 }
 0x255   : > { %2471 = vadd.xlane.f32.xlu1 %v2470_v25 }
 0x256   : > { %2532 = vadd.xlane.f32.xlu0 %v2531_v22 }
 0x259   : > { %2536 = vadd.xlane.f32.xlu1 %v2535_v56 }
 0x25a   : > { %2475 = vadd.xlane.f32.xlu0 %v2474_v59 }
 0x25e   : > { %2540 = vadd.xlane.f32.xlu0 %v2539_v9 }
 0x2cb   : > { %v2456_v54 = vpop.xlane.xlu0 %2455 }
 0x2cc   : > { %2480 = vst.msk [vmem:[%s4087_s23 + $0x10] sm:$0xff] %vm2477_vm9, %v2456_v54 }
 0x2ce   : > { %v2521_v24 = vpop.xlane.xlu1 %2520 }
 0x2cf   : > { %2544 = vst.msk [vmem:[%s4093_s26 + $0x10] sm:$0xff] %vm2477_vm9, %v2521_v24  ;;  %v2448_v33 = vpop.xlane.xlu0 %2447 }
 0x2d0   : > { %2478 = vst.msk [vmem:[%s4087_s23] sm:$0xff] %vm2477_vm9, %v2448_v33 }
 0x2d2   : > { %v2452_v6 = vpop.xlane.xlu1 %2451 }
 0x2d3   : > { %2479 = vst.msk [vmem:[%s4087_s23 + $0x8] sm:$0xff] %vm2477_vm9, %v2452_v6  ;;  %v2460_v19 = vpop.xlane.xlu0 %2459 }
 0x2d4   : > { %2481 = vst.msk [vmem:[%s4087_s23 + $0x18] sm:$0xff] %vm2477_vm9, %v2460_v19 }
 0x2d6   : > { %v2513_v11 = vpop.xlane.xlu1 %2512 }
 0x2d7   : > { %2542 = vst.msk [vmem:[%s4093_s26] sm:$0xff] %vm2477_vm9, %v2513_v11  ;;  %v2525_v21 = vpop.xlane.xlu0 %2524 }
 0x2d8   : > { %2545 = vst.msk [vmem:[%s4093_s26 + $0x18] sm:$0xff] %vm2477_vm9, %v2525_v21 }
 0x2da   : > { %v2464_v18 = vpop.xlane.xlu1 %2463 }
 0x2db   : > { %2482 = vst.msk [vmem:[%s4087_s23 + $0x20] sm:$0xff] %vm2477_vm9, %v2464_v18  ;;  %v2517_v23 = vpop.xlane.xlu0 %2516 }
 0x2dc   : > { %2543 = vst.msk [vmem:[%s4093_s26 + $0x8] sm:$0xff] %vm2477_vm9, %v2517_v23 }
 0x2de   : > { %v2529_v26 = vpop.xlane.xlu1 %2528 }
 0x2df   : > { %2546 = vst.msk [vmem:[%s4093_s26 + $0x20] sm:$0xff] %vm2477_vm9, %v2529_v26  ;;  %v2468_v27 = vpop.xlane.xlu0 %2467 }
 0x2e0   : > { %2483 = vst.msk [vmem:[%s4087_s23 + $0x28] sm:$0xff] %vm2477_vm9, %v2468_v27 }
 0x2e2   : > { %v2472_v28 = vpop.xlane.xlu1 %2471 }
 0x2e3   : > { %2484 = vst.msk [vmem:[%s4087_s23 + $0x30] sm:$0xff] %vm2477_vm9, %v2472_v28  ;;  %v2533_v29 = vpop.xlane.xlu0 %2532 }
 0x2e4   : > { %2547 = vst.msk [vmem:[%s4093_s26 + $0x28] sm:$0xff] %vm2477_vm9, %v2533_v29 }
 0x2e6   : > { %v2537_v30 = vpop.xlane.xlu1 %2536 }
 0x2e7   : > { %2548 = vst.msk [vmem:[%s4093_s26 + $0x30] sm:$0xff] %vm2477_vm9, %v2537_v30  ;;  %v2476_v48 = vpop.xlane.xlu0 %2475 }
 0x2e8   : > { %2485 = vst.msk [vmem:[%s4087_s23 + $0x38] sm:$0xff] %vm2477_vm9, %v2476_v48 }
 0x2eb   : > { %v2541_v2 = vpop.xlane.xlu0 %2540 }
 0x2ec   : > { %2549 = vst.msk [vmem:[%s4093_s26 + $0x38] sm:$0xff] %vm2477_vm9, %v2541_v2 }
 0x2ed PF: > { %s16_s18 = sadd.s32 1, %s3330_s18  }
 0x2ee   : > { %p13_p4 = scmp.ge.s32.totalorder %s16_s18, 4  }
 0x2f0   :  { %15 = sbr.rel (!%p13_p4) target bundleno = 1 (0x1), region = 94 }

</bundles_post_ra>
